<compile_context>
chip_gen: v6e
topology: v6e:2x2x1
jax: 0.10.0
libtpu: 0.0.40
codegen_flags: <defaults>
</compile_context>

<pallas_src>
import functools
import math

import jax
import jax.numpy as jnp
from jax import lax
from jax.experimental import pallas as pl
from jax.experimental.pallas import tpu as pltpu


def _round_up(x, m):
    return (x + m - 1) // m * m


def _bf16_eup_supported():
    """bf16 EUP/VPU exists on v6e / v7x; keep f32 exp on older chips."""
    try:
        kind = jax.devices()[0].device_kind.lower()
    except Exception:
        return False
    return ("v6" in kind) or ("v7" in kind)


# ---------------------------------------------------------------------------
# Fused kernel: QKV projection + tiled flash attention with online softmax.
# grid = (n_q_tiles, n_kv_tiles); q axis "parallel" (megacore), kv "arbitrary".
# ---------------------------------------------------------------------------
def _fused_mha_kernel(xq_ref, xkv_ref, w_ref, mask_ref, o_ref,
                      q_sc, m_sc, l_sc, acc_sc, *, bf16_exp):
    kv = pl.program_id(1)
    dp = q_sc.shape[1]  # padded head dim (128)

    @pl.when(kv == 0)
    def _init():
        # Project q once per q tile (Wq carries the folded 1/d scale).  The x
        # tile for q only changes with the q grid index, so it is not re-DMA'd
        # across kv steps.
        q_sc[...] = jnp.dot(xq_ref[...], w_ref[:, :dp],
                            preferred_element_type=jnp.float32).astype(q_sc.dtype)
        m_sc[...] = jnp.full_like(m_sc, -1e30)  # finite: avoids inf-inf NaNs
        l_sc[...] = jnp.zeros_like(l_sc)
        acc_sc[...] = jnp.zeros_like(acc_sc)

    # Project k / v for this kv tile (weights are VMEM-resident; the extra MXU
    # work is hidden — the loop is memory/EUP-bound at d=8).
    x_kv = xkv_ref[...]
    k = jnp.dot(x_kv, w_ref[:, dp:2 * dp],
                preferred_element_type=jnp.float32).astype(jnp.bfloat16)
    v = jnp.dot(x_kv, w_ref[:, 2 * dp:3 * dp],
                preferred_element_type=jnp.float32).astype(jnp.bfloat16)

    # logits[tq, tk] = q @ k^T : contract the feature axis directly so the MXU
    # consumes k in its stored layout (no XLU transpose).
    s = lax.dot_general(q_sc[...], k,
                        dimension_numbers=(((1,), (1,)), ((), ())),
                        preferred_element_type=jnp.float32)

    # masked_fill_(mask, -inf): large finite value -> exact 0 after exp.
    # TODO(synk): for block-structured masks, a scalar-prefetch per-(qi,ki)
    # summary could skip fully-masked tiles entirely.
    s = jnp.where(mask_ref[...] != 0, -1e30, s)

    # Online-softmax statistics: m / alpha / l stay f32 on every chip.
    m_prev = m_sc[...]
    m_new = jnp.maximum(m_prev, jnp.max(s, axis=-1, keepdims=True))
    alpha = jnp.exp(m_prev - m_new)                       # f32 always

    if bf16_exp:
        # v6e/v7x: bf16 EUP exp ~2x throughput; p is already bf16 for the MXU.
        p = jnp.exp((s - m_new).astype(jnp.bfloat16))
    else:
        # v5e and older: no bf16 EUP/VPU; exp in f32, cast for the MXU.
        p = jnp.exp(s - m_new).astype(jnp.bfloat16)

    l_sc[...] = alpha * l_sc[...] + jnp.sum(p, axis=-1, keepdims=True,
                                            dtype=jnp.float32)
    acc_sc[...] = alpha * acc_sc[...] + jnp.dot(
        p, v, preferred_element_type=jnp.float32)
    m_sc[...] = m_new

    @pl.when(kv == pl.num_programs(1) - 1)
    def _finalize():
        inv_l = pl.reciprocal(l_sc[...], approx=True)  # EUP slot, ~free
        o_ref[...] = (acc_sc[...] * inv_l).astype(o_ref.dtype)
        # TODO(synk): dropout on the attention weights omitted (identity, eval).
        # TODO(synk): fully-masked real rows yield a uniform average of V here,
        # whereas the torch reference yields NaN (softmax of all -inf).


# ---------------------------------------------------------------------------
# Wrapper
# ---------------------------------------------------------------------------
def multihead_attention(x0, w_qkv_t, mask, *, tq_max=512, tk_max=256,
                        bf16_exp=None, vmem_limit_bytes=32 * 1024 * 1024):
    """x0: [N, C] f32, w_qkv_t: [C, 3*d] f32 (transposed nn.Linear weight),
    mask: [N, N] bool/int (nonzero = masked).  Returns [N, d] f32."""
    N, C = x0.shape
    three_d = w_qkv_t.shape[1]
    assert three_d % 3 == 0
    d = three_d // 3

    if bf16_exp is None:
        bf16_exp = _bf16_eup_supported()

    Cp = _round_up(C, 128)   # lane-align the feature dim
    Dp = _round_up(d, 128)   # lane-dense q/k/v/out slabs (no vst.msk)

    # ---- tile sizing: multiples of 128, tk | tq, tq | Np ---------------------
    Np128 = _round_up(N, 128)
    tq = min(tq_max, Np128)
    tk = min(tk_max, Np128)
    if tq % tk != 0:
        tk = 128
    Np = _round_up(N, tq)
    n_q, n_kv = Np // tq, Np // tk

    # ---- wrapper-side layout plumbing (cheap XLA ops) ------------------------
    x_p = jnp.pad(x0, ((0, Np - N), (0, Cp - C))).astype(jnp.bfloat16)

    w_q = w_qkv_t[:, 0 * d:1 * d] * (1.0 / d)   # fold the 1/d scale into Wq
    w_k = w_qkv_t[:, 1 * d:2 * d]
    w_v = w_qkv_t[:, 2 * d:3 * d]
    pad_w = lambda w: jnp.pad(w, ((0, Cp - C), (0, Dp - d)))
    w_all = jnp.concatenate([pad_w(w_q), pad_w(w_k), pad_w(w_v)],
                            axis=1).astype(jnp.bfloat16)        # [Cp, 3*Dp]

    # int8 mask; padded key columns / query rows are marked masked (1).
    mask_p = jnp.pad(mask.astype(jnp.int8), ((0, Np - N), (0, Np - N)),
                     constant_values=1)

    kernel = functools.partial(_fused_mha_kernel, bf16_exp=bool(bf16_exp))

    out_p = pl.pallas_call(
        kernel,
        out_shape=jax.ShapeDtypeStruct((Np, Dp), jnp.bfloat16),
        grid_spec=pltpu.PrefetchScalarGridSpec(
            num_scalar_prefetch=0,
            grid=(n_q, n_kv),                                    # (q tiles, kv tiles)
            in_specs=[
                pl.BlockSpec((tq, Cp), lambda qi, ki: (qi, 0)),      # x rows for q
                pl.BlockSpec((tk, Cp), lambda qi, ki: (ki, 0)),      # x rows for k/v
                pl.BlockSpec((Cp, 3 * Dp), lambda qi, ki: (0, 0)),   # Wq|Wk|Wv slab
                pl.BlockSpec((tq, tk), lambda qi, ki: (qi, ki)),     # mask tile
            ],
            out_specs=pl.BlockSpec((tq, Dp), lambda qi, ki: (qi, 0)),
            scratch_shapes=[
                pltpu.VMEM((tq, Dp), jnp.bfloat16),   # projected q tile
                pltpu.VMEM((tq, 1), jnp.float32),     # running max m
                pltpu.VMEM((tq, 1), jnp.float32),     # running sum l
                pltpu.VMEM((tq, Dp), jnp.float32),    # output accumulator
            ]),
        compiler_params=pltpu.CompilerParams(
            dimension_semantics=("parallel", "arbitrary"),
            vmem_limit_bytes=vmem_limit_bytes),
    )(x_p, x_p, w_all, mask_p)

    return out_p[:N, :d].astype(jnp.float32)


# ---------------------------------------------------------------------------
# Pure-JAX f32 reference mirroring the PyTorch forward (dropout = identity).
# ---------------------------------------------------------------------------
def _reference(x0, w_qkv_t, mask):
    d = w_qkv_t.shape[1] // 3
    qkv = x0 @ w_qkv_t
    q, k, v = qkv[:, :d], qkv[:, d:2 * d], qkv[:, 2 * d:]
    logits = (q @ k.T) / d
    logits = jnp.where(mask, -jnp.inf, logits)
    att = jax.nn.softmax(logits, axis=-1)
    return att @ v


if __name__ == "__main__":
    # Small, deterministic example shapes:
    #   N (tokens) = 16, h_channels = 32, heads = 4 -> d = 8
    N, h_channels, heads = 16, 32, 4
    d = h_channels // heads

    key = jax.random.PRNGKey(0)
    kx, kw, km = jax.random.split(key, 3)

    x0 = jax.random.normal(kx, (N, h_channels), dtype=jnp.float32)

    # nn.Linear(h_channels, 3*d, bias=False): weight [3*d, h_channels]; store
    # transposed [h_channels, 3*d], init ~ U(-1/sqrt(C), 1/sqrt(C)) like PyTorch.
    bound = 1.0 / jnp.sqrt(jnp.float32(h_channels))
    w_qkv_t = jax.random.uniform(
        kw, (h_channels, 3 * d), dtype=jnp.float32, minval=-bound, maxval=bound)

    # Random boolean mask (True = masked); keep the diagonal unmasked so no row
    # is fully masked (which would yield NaNs in the torch reference).
    mask = jax.random.uniform(km, (N, N)) > 0.7
    mask = mask & (~jnp.eye(N, dtype=bool))

    out = multihead_attention(x0, w_qkv_t, mask)
    out = jax.block_until_ready(out)

    ref = _reference(x0, w_qkv_t, mask)
    assert out.shape == (N, d)
    # bf16 MXU inputs, bf16 output slab + approx reciprocal: compare against the
    # f32 reference with a tolerance appropriate for bf16 rounding.
    assert jnp.allclose(out, ref, atol=2e-2, rtol=2e-2), "mismatch vs reference"

    print("KERNEL_OK")
</pallas_src>

<mosaic_0001>
module attributes {stable_mosaic.version = 11 : i64} {
  func.func @_fused_mha_kernel(%arg0: i32, %arg1: i32, %arg2: memref<128x128xbf16, #tpu.memory_space<vmem>>, %arg3: memref<128x128xbf16, #tpu.memory_space<vmem>>, %arg4: memref<128x384xbf16, #tpu.memory_space<vmem>>, %arg5: memref<128x128xi8, #tpu.memory_space<vmem>>, %arg6: memref<128x128xbf16, #tpu.memory_space<vmem>>, %arg7: memref<128x128xbf16, #tpu.memory_space<vmem>>, %arg8: memref<128x1xf32, #tpu.memory_space<vmem>>, %arg9: memref<128x1xf32, #tpu.memory_space<vmem>>, %arg10: memref<128x128xf32, #tpu.memory_space<vmem>>) attributes {dimension_semantics = [#tpu.dimension_semantics<parallel>, #tpu.dimension_semantics<arbitrary>], iteration_bounds = array<i64: 1, 1>, scalar_prefetch = 0 : i64, scratch_operands = 4 : i64, tpu.core_type = #tpu.core_type<tc>, window_params = [{transform_indices = @transform_0, window_bounds = array<i64: 128, 128>}, {transform_indices = @transform_1, window_bounds = array<i64: 128, 128>}, {pipeline_mode = #tpu.pipeline_mode<synchronous>, transform_indices = @transform_2, window_bounds = array<i64: 128, 384>}, {transform_indices = @transform_3, window_bounds = array<i64: 128, 128>}, {transform_indices = @transform_4, window_bounds = array<i64: 128, 128>}]} {
    %c0_i32 = arith.constant 0 : i32
    %0 = arith.cmpi eq, %arg1, %c0_i32 : i32
    %1 = arith.extui %0 : i1 to i32
    %c0_i32_0 = arith.constant 0 : i32
    %2 = arith.cmpi ne, %1, %c0_i32_0 : i32
    scf.if %2 {
      %c0_28 = arith.constant 0 : index
      %c0_29 = arith.constant 0 : index
      %44 = vector.load %arg2[%c0_28, %c0_29] : memref<128x128xbf16, #tpu.memory_space<vmem>>, vector<128x128xbf16>
      %c0_30 = arith.constant 0 : index
      %c0_31 = arith.constant 0 : index
      %45 = vector.load %arg4[%c0_30, %c0_31] : memref<128x384xbf16, #tpu.memory_space<vmem>>, vector<128x128xbf16>
      %cst_32 = arith.constant dense<0.000000e+00> : vector<128x128xf32>
      %46 = tpu.matmul %44, %45, %cst_32 {dimension_numbers = #tpu.dot_dimension_numbers<[1], [0], [0], [1], [0, 0, 1, 1], [], []>} : vector<128x128xbf16>, vector<128x128xbf16>, vector<128x128xf32> -> vector<128x128xf32>
      %47 = arith.truncf %46 : vector<128x128xf32> to vector<128x128xbf16>
      %c0_33 = arith.constant 0 : index
      %c0_34 = arith.constant 0 : index
      %48 = vector.load %arg7[%c0_33, %c0_34] : memref<128x128xbf16, #tpu.memory_space<vmem>>, vector<128x128xbf16>
      tpu.vector_store %arg7[%c0_33, %c0_34], %47 {strides = array<i32>} : memref<128x128xbf16, #tpu.memory_space<vmem>>, vector<128x128xbf16>,
      %cst_35 = arith.constant -1.000000e+30 : f32
      %49 = vector.broadcast %cst_35 : f32 to vector<128x1xf32>
      %c0_36 = arith.constant 0 : index
      %c0_37 = arith.constant 0 : index
      %50 = vector.load %arg8[%c0_36, %c0_37] : memref<128x1xf32, #tpu.memory_space<vmem>>, vector<128x1xf32>
      tpu.vector_store %arg8[%c0_36, %c0_37], %49 {strides = array<i32>} : memref<128x1xf32, #tpu.memory_space<vmem>>, vector<128x1xf32>,
      %cst_38 = arith.constant 0.000000e+00 : f32
      %51 = vector.broadcast %cst_38 : f32 to vector<128x1xf32>
      %c0_39 = arith.constant 0 : index
      %c0_40 = arith.constant 0 : index
      %52 = vector.load %arg9[%c0_39, %c0_40] : memref<128x1xf32, #tpu.memory_space<vmem>>, vector<128x1xf32>
      tpu.vector_store %arg9[%c0_39, %c0_40], %51 {strides = array<i32>} : memref<128x1xf32, #tpu.memory_space<vmem>>, vector<128x1xf32>,
      %cst_41 = arith.constant 0.000000e+00 : f32
      %53 = vector.broadcast %cst_41 : f32 to vector<128x128xf32>
      %c0_42 = arith.constant 0 : index
      %c0_43 = arith.constant 0 : index
      %54 = vector.load %arg10[%c0_42, %c0_43] : memref<128x128xf32, #tpu.memory_space<vmem>>, vector<128x128xf32>
      tpu.vector_store %arg10[%c0_42, %c0_43], %53 {strides = array<i32>} : memref<128x128xf32, #tpu.memory_space<vmem>>, vector<128x128xf32>,
    } else {
    }
    %c0 = arith.constant 0 : index
    %c0_1 = arith.constant 0 : index
    %3 = vector.load %arg3[%c0, %c0_1] : memref<128x128xbf16, #tpu.memory_space<vmem>>, vector<128x128xbf16>
    %c0_2 = arith.constant 0 : index
    %c128 = arith.constant 128 : index
    %4 = vector.load %arg4[%c0_2, %c128] : memref<128x384xbf16, #tpu.memory_space<vmem>>, vector<128x128xbf16>
    %cst = arith.constant dense<0.000000e+00> : vector<128x128xf32>
    %5 = tpu.matmul %3, %4, %cst {dimension_numbers = #tpu.dot_dimension_numbers<[1], [0], [0], [1], [0, 0, 1, 1], [], []>} : vector<128x128xbf16>, vector<128x128xbf16>, vector<128x128xf32> -> vector<128x128xf32>
    %6 = arith.truncf %5 : vector<128x128xf32> to vector<128x128xbf16>
    %c0_3 = arith.constant 0 : index
    %c256 = arith.constant 256 : index
    %7 = vector.load %arg4[%c0_3, %c256] : memref<128x384xbf16, #tpu.memory_space<vmem>>, vector<128x128xbf16>
    %cst_4 = arith.constant dense<0.000000e+00> : vector<128x128xf32>
    %8 = tpu.matmul %3, %7, %cst_4 {dimension_numbers = #tpu.dot_dimension_numbers<[1], [0], [0], [1], [0, 0, 1, 1], [], []>} : vector<128x128xbf16>, vector<128x128xbf16>, vector<128x128xf32> -> vector<128x128xf32>
    %9 = arith.truncf %8 : vector<128x128xf32> to vector<128x128xbf16>
    %c0_5 = arith.constant 0 : index
    %c0_6 = arith.constant 0 : index
    %10 = vector.load %arg7[%c0_5, %c0_6] : memref<128x128xbf16, #tpu.memory_space<vmem>>, vector<128x128xbf16>
    %cst_7 = arith.constant dense<0.000000e+00> : vector<128x128xf32>
    %11 = tpu.matmul %10, %6, %cst_7 {dimension_numbers = #tpu.dot_dimension_numbers<[1], [1], [0], [0], [0, 0, 1, 0], [], []>} : vector<128x128xbf16>, vector<128x128xbf16>, vector<128x128xf32> -> vector<128x128xf32>
    %c0_8 = arith.constant 0 : index
    %c0_9 = arith.constant 0 : index
    %12 = vector.load %arg5[%c0_8, %c0_9] : memref<128x128xi8, #tpu.memory_space<vmem>>, vector<128x128xi8>
    %c0_i8 = arith.constant 0 : i8
    %13 = vector.broadcast %c0_i8 : i8 to vector<128x128xi8>
    %14 = arith.cmpi ne, %12, %13 : vector<128x128xi8>
    %cst_10 = arith.constant -1.000000e+30 : f32
    %15 = vector.broadcast %cst_10 : f32 to vector<128x128xf32>
    %16 = arith.select %14, %15, %11 : vector<128x128xi1>, vector<128x128xf32>
    %c0_11 = arith.constant 0 : index
    %c0_12 = arith.constant 0 : index
    %17 = vector.load %arg8[%c0_11, %c0_12] : memref<128x1xf32, #tpu.memory_space<vmem>>, vector<128x1xf32>
    %cst_13 = arith.constant dense<0xFF800000> : vector<128xf32>
    %18 = vector.multi_reduction <maximumf>, %16, %cst_13 [1] : vector<128x128xf32> to vector<128xf32>
    %19 = vector.shape_cast %18 : vector<128xf32> to vector<128x1xf32>
    %20 = arith.maximumf %17, %19 : vector<128x1xf32>
    %21 = arith.subf %17, %20 : vector<128x1xf32>
    %22 = math.exp %21 : vector<128x1xf32>
    %23 = vector.broadcast %20 : vector<128x1xf32> to vector<128x128xf32>
    %24 = arith.subf %16, %23 : vector<128x128xf32>
    %25 = math.exp %24 : vector<128x128xf32>
    %26 = arith.truncf %25 : vector<128x128xf32> to vector<128x128xbf16>
    %c0_14 = arith.constant 0 : index
    %c0_15 = arith.constant 0 : index
    %27 = vector.load %arg9[%c0_14, %c0_15] : memref<128x1xf32, #tpu.memory_space<vmem>>, vector<128x1xf32>
    %28 = arith.mulf %22, %27 : vector<128x1xf32>
    %29 = arith.extf %26 : vector<128x128xbf16> to vector<128x128xf32>
    %cst_16 = arith.constant dense<0.000000e+00> : vector<128xf32>
    %30 = vector.multi_reduction <add>, %29, %cst_16 [1] : vector<128x128xf32> to vector<128xf32>
    %31 = vector.shape_cast %30 : vector<128xf32> to vector<128x1xf32>
    %32 = arith.addf %28, %31 : vector<128x1xf32>
    %c0_17 = arith.constant 0 : index
    %c0_18 = arith.constant 0 : index
    %33 = vector.load %arg9[%c0_17, %c0_18] : memref<128x1xf32, #tpu.memory_space<vmem>>, vector<128x1xf32>
    tpu.vector_store %arg9[%c0_17, %c0_18], %32 {strides = array<i32>} : memref<128x1xf32, #tpu.memory_space<vmem>>, vector<128x1xf32>,
    %c0_19 = arith.constant 0 : index
    %c0_20 = arith.constant 0 : index
    %34 = vector.load %arg10[%c0_19, %c0_20] : memref<128x128xf32, #tpu.memory_space<vmem>>, vector<128x128xf32>
    %35 = vector.broadcast %22 : vector<128x1xf32> to vector<128x128xf32>
    %36 = arith.mulf %35, %34 : vector<128x128xf32>
    %cst_21 = arith.constant dense<0.000000e+00> : vector<128x128xf32>
    %37 = tpu.matmul %26, %9, %cst_21 {dimension_numbers = #tpu.dot_dimension_numbers<[1], [0], [0], [1], [0, 0, 1, 1], [], []>} : vector<128x128xbf16>, vector<128x128xbf16>, vector<128x128xf32> -> vector<128x128xf32>
    %38 = arith.addf %36, %37 : vector<128x128xf32>
    %c0_22 = arith.constant 0 : index
    %c0_23 = arith.constant 0 : index
    %39 = vector.load %arg10[%c0_22, %c0_23] : memref<128x128xf32, #tpu.memory_space<vmem>>, vector<128x128xf32>
    tpu.vector_store %arg10[%c0_22, %c0_23], %38 {strides = array<i32>} : memref<128x128xf32, #tpu.memory_space<vmem>>, vector<128x128xf32>,
    %c0_24 = arith.constant 0 : index
    %c0_25 = arith.constant 0 : index
    %40 = vector.load %arg8[%c0_24, %c0_25] : memref<128x1xf32, #tpu.memory_space<vmem>>, vector<128x1xf32>
    tpu.vector_store %arg8[%c0_24, %c0_25], %20 {strides = array<i32>} : memref<128x1xf32, #tpu.memory_space<vmem>>, vector<128x1xf32>,
    %c0_i32_26 = arith.constant 0 : i32
    %41 = arith.cmpi eq, %arg1, %c0_i32_26 : i32
    %42 = arith.extui %41 : i1 to i32
    %c0_i32_27 = arith.constant 0 : i32
    %43 = arith.cmpi ne, %42, %c0_i32_27 : i32
    scf.if %43 {
      %c0_28 = arith.constant 0 : index
      %c0_29 = arith.constant 0 : index
      %44 = vector.load %arg9[%c0_28, %c0_29] : memref<128x1xf32, #tpu.memory_space<vmem>>, vector<128x1xf32>
      %45 = tpu.reciprocal %44 {approx = true} : vector<128x1xf32> -> vector<128x1xf32>
      %c0_30 = arith.constant 0 : index
      %c0_31 = arith.constant 0 : index
      %46 = vector.load %arg10[%c0_30, %c0_31] : memref<128x128xf32, #tpu.memory_space<vmem>>, vector<128x128xf32>
      %47 = vector.broadcast %45 : vector<128x1xf32> to vector<128x128xf32>
      %48 = arith.mulf %46, %47 : vector<128x128xf32>
      %49 = arith.truncf %48 : vector<128x128xf32> to vector<128x128xbf16>
      %c0_32 = arith.constant 0 : index
      %c0_33 = arith.constant 0 : index
      %50 = vector.load %arg6[%c0_32, %c0_33] : memref<128x128xbf16, #tpu.memory_space<vmem>>, vector<128x128xbf16>
      tpu.vector_store %arg6[%c0_32, %c0_33], %49 {strides = array<i32>} : memref<128x128xbf16, #tpu.memory_space<vmem>>, vector<128x128xbf16>,
    } else {
    }
    return
  }
  func.func @transform_0(%arg0: i32, %arg1: i32) -> (i32, i32) {
    %c0_i32 = arith.constant 0 : i32
    %c0_i32_0 = arith.constant 0 : i32
    return %arg0, %c0_i32 : i32, i32
  }
  func.func @transform_1(%arg0: i32, %arg1: i32) -> (i32, i32) {
    %c0_i32 = arith.constant 0 : i32
    %c0_i32_0 = arith.constant 0 : i32
    return %arg1, %c0_i32 : i32, i32
  }
  func.func @transform_2(%arg0: i32, %arg1: i32) -> (i32, i32) {
    %c0_i32 = arith.constant 0 : i32
    %c0_i32_0 = arith.constant 0 : i32
    %c0_i32_1 = arith.constant 0 : i32
    return %c0_i32, %c0_i32_0 : i32, i32
  }
  func.func @transform_3(%arg0: i32, %arg1: i32) -> (i32, i32) {
    %c0_i32 = arith.constant 0 : i32
    return %arg0, %arg1 : i32, i32
  }
  func.func @transform_4(%arg0: i32, %arg1: i32) -> (i32, i32) {
    %c0_i32 = arith.constant 0 : i32
    %c0_i32_0 = arith.constant 0 : i32
    return %arg0, %c0_i32 : i32, i32
  }
}

</mosaic_0001>

<bundles_post_ra>
// kernel: tpu_custom_call.1
= control target key start
LH: loop header
LB: loop body
LE: loop exit
PB: predicated region body
PF: predicated region fallthrough
CT: control target
= control target key end

     0   :  { %9 = vsyncpa [#allocation7], 0  ;;  %s3278_s0 = inlined_call_operand.hbm [shape: bf16[128,128], index: 0, kind: input, shape index: {}]   ;;  %s3279_s1 = inlined_call_operand.hbm [shape: bf16[128,128], index: 1, kind: input, shape index: {}]   ;;  %s3280_s2 = inlined_call_operand.hbm [shape: bf16[128,384], index: 2, kind: input, shape index: {}]   ;;  %s3281_s3 = inlined_call_operand.hbm [shape: s8[128,128], index: 3, kind: input, shape index: {}]   ;;  %s3282_s4 = inlined_call_operand.hbm [shape: bf16[128,128], index: 4, kind: output, shape index: {}]  }
   0x1   :  { %10 = vsyncpa [#allocation10], 0 }
   0x2   :  { %11 = vsyncpa [#allocation13], 0 }
   0x3   :  { %12 = vsyncpa [#allocation8], 0  ;;  %s2715_s15 = smov [#allocation9]   ;;  %s2716_s17 = smov [#allocation6]  }
   0x4   :  { %s30_s16 = sshll.u32 %s2715_s15, 4  ;;  %s18_s18 = sshll.u32 %s2716_s17, 4  ;;  %s31_s16 = int_to_ptr.vmem [resolvable:$true] %s30_s16  ;;  %s19_s18 = int_to_ptr.vmem [resolvable:$true] %s18_s18 }
   0x5   :  { %s2615_s19 = scalar_lea.vmem %s31_s16, 1024  ;;  %p2620_p1 = scmp.lt.s32.totalorder %s31_s16, %s31_s16 }
   0x6   :  { %p2616_p0 = scmp.ne.s32.totalorder %s31_s16, %s2615_s19  ;;  %p2621_p2 = scmp.lt.s32.totalorder %s2615_s19, %s2615_s19 }
   0x8   :  { %p2622_p3 = por %p2621_p2, %p2620_p1 }
   0xa   :  { %p2623_p4 = pnand %p2622_p3, %p2616_p0 }
   0xc   :  { %2626 = shalt.err (!%p2623_p4)
}
   0xd   :  { %s2717_s20 = smov 64   ;;  %s2718_s21 = smov 4  }
   0xe   :  { %36 = dma.hbm_to_vmem [thread:$0]  %s3279_s1, 1024, %s31_s16, [#allocation10], %s2717_s20, %s2717_s20, %s2718_s21  }
   0xf   :  { %s2635_s24 = scalar_lea.vmem %s19_s18, 1024  ;;  %p2640_p6 = scmp.lt.s32.totalorder %s19_s18, %s19_s18 }
  0x10   :  { %p2636_p5 = scmp.ne.s32.totalorder %s19_s18, %s2635_s24  ;;  %p2641_p7 = scmp.lt.s32.totalorder %s2635_s24, %s2635_s24 }
  0x12   :  { %p2642_p8 = por %p2641_p7, %p2640_p6 }
  0x14   :  { %p2643_p9 = pnand %p2642_p8, %p2636_p5 }
  0x16   :  { %2646 = shalt.err (!%p2643_p9)
}
  0x17   :  { %24 = dma.hbm_to_vmem [thread:$0]  %s3278_s0, 1024, %s19_s18, [#allocation7], %s2717_s20, %s2717_s20, %s2718_s21  }
  0x18   :  { %s2719_s27 = smov [#allocation11]  }
  0x19   :  { %s42_s28 = sshll.u32 %s2719_s27, 4  ;;  %s43_s28 = int_to_ptr.vmem [resolvable:$true] %s42_s28 }
  0x1a   :  { %s2655_s29 = scalar_lea.vmem %s43_s28, 3072  ;;  %p2660_p11 = scmp.lt.s32.totalorder %s43_s28, %s43_s28 }
  0x1b   :  { %p2656_p10 = scmp.ne.s32.totalorder %s43_s28, %s2655_s29  ;;  %p2661_p12 = scmp.lt.s32.totalorder %s2655_s29, %s2655_s29 }
  0x1d   :  { %p2662_p13 = por %p2661_p12, %p2660_p11 }
  0x1f   :  { %p2663_p0 = pnand %p2662_p13, %p2656_p10 }
  0x21   :  { %2666 = shalt.err (!%p2663_p0)
}
  0x22   :  { %s2720_s1 = smov 192   ;;  %s2721_s30 = smov 12  }
  0x23   :  { %48 = dma.hbm_to_vmem [thread:$0]  %s3280_s2, 3072, %s43_s28, [#allocation10], %s2720_s1, %s2720_s1, %s2721_s30  }
  0x24   :  { %s2722_s7 = smov [#allocation12]  }
  0x25   :  { %s54_s8 = sshll.u32 %s2722_s7, 4  ;;  %s55_s8 = int_to_ptr.vmem [resolvable:$true] %s54_s8 }
  0x26   :  { %s2675_s0 = scalar_lea.vmem %s55_s8, 512  ;;  %p2680_p2 = scmp.lt.s32.totalorder %s55_s8, %s55_s8 }
  0x27   :  { %p2676_p1 = scmp.ne.s32.totalorder %s55_s8, %s2675_s0  ;;  %p2681_p3 = scmp.lt.s32.totalorder %s2675_s0, %s2675_s0 }
  0x29   :  { %p2682_p4 = por %p2681_p3, %p2680_p2 }
  0x2b   :  { %p2683_p5 = pnand %p2682_p4, %p2676_p1 }
  0x2d   :  { %2686 = shalt.err (!%p2683_p5)
}
  0x2e   :  { %s2723_s9 = smov 128   ;;  %s2724_s10 = smov 8  }
  0x2f   :  { %60 = dma.hbm_to_vmem [thread:$0]  %s3281_s3, 512, %s55_s8, [#allocation13], %s2723_s9, %s2723_s9, %s2724_s10  }
  0x30   :  { %2707 = dma.done.wait [#allocation7], 1024  }
  0x31   :  { %2708 = vsyncadd [#allocation7], 4294966272 }
  0x32   :  { %2709 = dma.done.wait [#allocation10], 4096  }
  0x33   :  { %2710 = vsyncadd [#allocation10], 4294963200 }
  0x34   :  { %2711 = dma.done.wait [#allocation13], 512  }
  0x35   :  { %2712 = vsyncadd [#allocation13], 4294966784  ;;  %v2463_v0 = vld [vmem:[#allocation11 + $0xac] ss:$12 sps:$4 sm:$0xff]   ;;  %v2464_v1 = vld [vmem:[#allocation11 + $0x94] ss:$12 sps:$4 sm:$0xff]  }
  0x36   :  { %2319 = vmatprep.subr.bf16.mxu1 %v2463_v0  ;;  %v2465_v2 = vld [vmem:[#allocation11 + $0x7c] ss:$12 sps:$4 sm:$0xff]   ;;  %v2466_v3 = vld [vmem:[#allocation11 + $0x64] ss:$12 sps:$4 sm:$0xff]   ;;  %v2467_v5 = vld [vmem:[#allocation11 + $0x4c] ss:$12 sps:$4 sm:$0xff]  }
  0x37   :  { %2320 = vmatpush3.bf16.msra.mxu1 %v2463_v0  ;;  %v2772_v4 = vld [vmem:[#allocation9] sm:$0xff]   ;;  %v2479_v7 = vld [vmem:[#allocation11 + $0xa8] ss:$12 sps:$4 sm:$0xff]   ;;  %v2480_v8 = vld [vmem:[#allocation11 + $0x90] ss:$12 sps:$4 sm:$0xff]   ;;  %vm385_vm0 = vcmask 7168  }
  0x38   :  { %2321 = vmatprep.subr.bf16.mxu1 %v2464_v1  ;;  %2335 = vmatprep.mubr.bf16.mxu1 %v2772_v4  ;;  %v2468_v6 = vld [vmem:[#allocation11 + $0x34] ss:$12 sps:$4 sm:$0xff]   ;;  %v2469_v9 = vld [vmem:[#allocation11 + $0x1c] ss:$12 sps:$4 sm:$0xff]   ;;  %v2481_v10 = vld [vmem:[#allocation11 + $0x78] ss:$12 sps:$4 sm:$0xff]  }
  0x39   :  { %2287 = vmatprep.subr.bf16.mxu0 %v2479_v7  ;;  %v2470_v11 = vld [vmem:[#allocation11 + $0x4] ss:$12 sps:$4 sm:$0xff]   ;;  %v2482_v12 = vld [vmem:[#allocation11 + $0x60] ss:$12 sps:$4 sm:$0xff]   ;;  %v2483_v14 = vld [vmem:[#allocation11 + $0x48] ss:$12 sps:$4 sm:$0xff]  }
  0x3a   :  { %2288 = vmatpush3.bf16.msra.mxu0 %v2479_v7  ;;  %v2487_v13 = vld [vmem:[#allocation6] sm:$0xff]   ;;  %v2775_v15 = vld [vmem:[#allocation9 + $0x8] sm:$0xff]   ;;  %v2777_v16 = vld [vmem:[#allocation9 + $0x10] sm:$0xff]   ;;  %s2728_s2 = smov [#allocation14]  }
  0x3b   :  { %2322 = vmatpush3.bf16.msra.mxu1 %v2464_v1  ;;  %2289 = vmatprep.subr.bf16.mxu0 %v2480_v8  ;;  %v2484_v17 = vld [vmem:[#allocation11 + $0x30] ss:$12 sps:$4 sm:$0xff]   ;;  %v2485_v18 = vld [vmem:[#allocation11 + $0x18] ss:$12 sps:$4 sm:$0xff]   ;;  %v2486_v21 = vld [vmem:[#allocation11] ss:$12 sps:$4 sm:$0xff]  }
  0x3c   :  { %2323 = vmatprep.subr.bf16.mxu1 %v2465_v2  ;;  %2303 = vmatprep.mubr.bf16.mxu0 %v2487_v13  ;;  %v2781_v19 = vld [vmem:[#allocation9 + $0x18] sm:$0xff]   ;;  %v2783_v20 = vld [vmem:[#allocation9 + $0x20] sm:$0xff]   ;;  %v2787_v22 = vld [vmem:[#allocation9 + $0x28] sm:$0xff]   ;;  %s1987_s3 = sshll.u32 %s2728_s2, 4  ;;  %s1988_s3 = int_to_ptr.vmem [resolvable:$true] %s1987_s3 }
  0x3d   :  { %v2488_v23 = vld [vmem:[#allocation6 + $0x8] sm:$0xff]   ;;  %v2789_v24 = vld [vmem:[#allocation9 + $0x30] sm:$0xff]   ;;  %v2793_v26 = vld [vmem:[#allocation9 + $0x38] sm:$0xff]   ;;  %s2687_s13 = scalar_lea.vmem %s1988_s3, 1024  ;;  %p2692_p7 = scmp.lt.s32.totalorder %s1988_s3, %s1988_s3 }
  0x3e   :  { %2290 = vmatpush3.bf16.msra.mxu0 %v2480_v8  ;;  %v2489_v25 = vld [vmem:[#allocation6 + $0x10] sm:$0xff]   ;;  %v2490_v27 = vld [vmem:[#allocation6 + $0x18] sm:$0xff]   ;;  %v2491_v28 = vld [vmem:[#allocation6 + $0x20] sm:$0xff]   ;;  %p2688_p6 = scmp.ne.s32.totalorder %s1988_s3, %s2687_s13  ;;  %p2693_p8 = scmp.lt.s32.totalorder %s2687_s13, %s2687_s13 }
  0x3f   :  { %2324 = vmatpush3.bf16.msra.mxu1 %v2465_v2  ;;  %2291 = vmatprep.subr.bf16.mxu0 %v2481_v10  ;;  %v2492_v29 = vld [vmem:[#allocation6 + $0x28] sm:$0xff]   ;;  %v2493_v30 = vld [vmem:[#allocation6 + $0x30] sm:$0xff]   ;;  %v2494_v31 = vld [vmem:[#allocation6 + $0x38] sm:$0xff]  }
  0x40   :  { %2325 = vmatprep.subr.bf16.mxu1 %v2466_v3  ;;  %p2694_p9 = por %p2693_p8, %p2692_p7 }
  0x42   :  { %2292 = vmatpush3.bf16.msra.mxu0 %v2481_v10  ;;  %p2695_p10 = pnand %p2694_p9, %p2688_p6 }
  0x43   :  { %2326 = vmatpush3.bf16.msra.mxu1 %v2466_v3  ;;  %2293 = vmatprep.subr.bf16.mxu0 %v2482_v12 }
  0x44   :  { %2327 = vmatprep.subr.bf16.mxu1 %v2467_v5 }
  0x46   :  { %2294 = vmatpush3.bf16.msra.mxu0 %v2482_v12 }
  0x47   :  { %2328 = vmatpush3.bf16.msra.mxu1 %v2467_v5  ;;  %2295 = vmatprep.subr.bf16.mxu0 %v2483_v14 }
  0x48   :  { %2329 = vmatprep.subr.bf16.mxu1 %v2468_v6 }
  0x4a   :  { %2296 = vmatpush3.bf16.msra.mxu0 %v2483_v14 }
  0x4b   :  { %2330 = vmatpush3.bf16.msra.mxu1 %v2468_v6  ;;  %2297 = vmatprep.subr.bf16.mxu0 %v2484_v17 }
  0x4c   :  { %2331 = vmatprep.subr.bf16.mxu1 %v2469_v9 }
  0x4e   :  { %2298 = vmatpush3.bf16.msra.mxu0 %v2484_v17 }
  0x4f   :  { %2332 = vmatpush3.bf16.msra.mxu1 %v2469_v9  ;;  %2299 = vmatprep.subr.bf16.mxu0 %v2485_v18 }
  0x50   :  { %2333 = vmatprep.subr.bf16.mxu1 %v2470_v11 }
  0x52   :  { %2300 = vmatpush3.bf16.msra.mxu0 %v2485_v18 }
  0x53   :  { %2334 = vmatpush3.bf16.msra.mxu1 %v2470_v11  ;;  %2301 = vmatprep.subr.bf16.mxu0 %v2486_v21 }
  0x56   :  { %2336 = vmatmul.mubr.bf16.vlgmr.msra.gmra.mxu1 %v2775_v15  ;;  %2302 = vmatpush3.bf16.msra.mxu0 %v2486_v21 }
  0x57   :  { %2339 = vmatprep.mubr.bf16.mxu1 %v2777_v16 }
  0x59   :  { %2304 = vmatmul.mubr.bf16.vlgmr.msra.gmra.mxu0 %v2488_v23 }
  0x5a   :  { %2307 = vmatprep.mubr.bf16.mxu0 %v2489_v25 }
  0x5e   :  { %2340 = vmatmul.mubr.bf16.gmra.mxu1 %v2781_v19 }
  0x5f   :  { %2343 = vmatprep.mubr.bf16.mxu1 %v2783_v20 }
  0x61   :  { %2308 = vmatmul.mubr.bf16.gmra.mxu0 %v2490_v27 }
  0x62   :  { %2311 = vmatprep.mubr.bf16.mxu0 %v2491_v28 }
  0x66   :  { %2344 = vmatmul.mubr.bf16.gmra.mxu1 %v2787_v22 }
  0x67   :  { %2347 = vmatprep.mubr.bf16.mxu1 %v2789_v24 }
  0x69   :  { %2312 = vmatmul.mubr.bf16.gmra.mxu0 %v2492_v29 }
  0x6a   :  { %2315 = vmatprep.mubr.bf16.mxu0 %v2493_v30 }
  0x6e   :  { %2348 = vmatmul.mubr.bf16.gmra.mxu1 %v2793_v26 }
  0x71   :  { %2316 = vmatmul.mubr.bf16.gmra.mxu0 %v2494_v31  ;;  %v2725_v31 = vmov 0  }
  0x72   :  { %2367 = vmatprep.mubr.bf16.mxu0 %v2772_v4  ;;  %2462 = vset.pattern.permute.xlu1 %v2725_v31 }
  0x73   :  { %2461 = vset.pattern.permute.xlu0 %v2725_v31 }
 0x116   :  { %v2337_v32 = vpop.f32.mrf.mxu1 }
 0x118   :  { %v596_v33 = vpop.f32.mrf.mxu1 }
 0x119   :  { %v2305_v43 = vpop.f32.mrf.mxu0 }
 0x11a   :  { %v2338_v34 = vpop.f32.mrf.mxu1 }
 0x11b   :  { %v2797_v35 = vpack.c.bf16 %v2338_v34, %v2337_v32  ;;  %v242_v45 = vpop.f32.mrf.mxu0  ;;  %v2503_v32 = vld [vmem:[#allocation11 + $0xb0] ss:$12 sps:$4 sm:$0xff]   ;;  %v2505_v34 = vld [vmem:[#allocation11 + $0x80] ss:$12 sps:$4 sm:$0xff]  }
 0x11c   :  { %v599_v36 = vpop.f32.mrf.mxu1  ;;  %2351 = vmatprep.subr.bf16.mxu0 %v2503_v32 }
 0x11d   :  { %v2799_v37 = vpack.c.bf16 %v599_v36, %v596_v33  ;;  %v2306_v47 = vpop.f32.mrf.mxu0  ;;  %2352 = vmatpush3.bf16.msra.mxu0 %v2503_v32  ;;  %v2504_v33 = vld [vmem:[#allocation11 + $0x98] ss:$12 sps:$4 sm:$0xff]   ;;  %v2507_v36 = vld [vmem:[#allocation11 + $0x50] ss:$12 sps:$4 sm:$0xff]  }
 0x11e   :  { %v2341_v38 = vpop.f32.mrf.mxu1  ;;  %v2121_v48 = vpack.c.bf16 %v2306_v47, %v2305_v43  ;;  %2353 = vmatprep.subr.bf16.mxu0 %v2504_v33 }
 0x11f   :  { %v245_v50 = vpop.f32.mrf.mxu0 }
 0x120   :  { %v612_v39 = vpop.f32.mrf.mxu1  ;;  %2193 = vst [vmem:[#allocation2 + $0x8] sm:$0xff] %v2121_v48   ;;  %v2116_v51 = vpack.c.bf16 %v245_v50, %v242_v45  ;;  %v998_v45 = vld [vmem:[#allocation12 + $0x8] sm:$0xff] }
 0x121   :  { %v2309_v53 = vpop.f32.mrf.mxu0  ;;  %2354 = vmatpush3.bf16.msra.mxu0 %v2504_v33  ;;  %vm1002_vm2 = vnez %v998_v45 }
 0x122   :  { %v2342_v40 = vpop.f32.mrf.mxu1  ;;  %2117 = vst [vmem:[#allocation2] sm:$0xff] %v2116_v51   ;;  %2355 = vmatprep.subr.bf16.mxu0 %v2505_v34 }
 0x123   :  { %v258_v55 = vpop.f32.mrf.mxu0  ;;  %v662_v17 = vpack.c.bf16 %v2342_v40, %v2341_v38  ;;  %v2509_v38 = vld [vmem:[#allocation11 + $0x20] ss:$12 sps:$4 sm:$0xff]   ;;  %v2726_v40 = vmov -1e+30  }
 0x124   :  { %v615_v41 = vpop.f32.mrf.mxu1  ;;  %388 = vst.msk [vmem:[#allocation3 + $0x10] sm:$0xff] %vm385_vm0, %v2726_v40  ;;  %386 = vst.msk [vmem:[#allocation3] sm:$0xff] %vm385_vm0, %v2726_v40 }
 0x125   :  { %v2310_v57 = vpop.f32.mrf.mxu0  ;;  %v661_v18 = vpack.c.bf16 %v615_v41, %v612_v39  ;;  %2356 = vmatpush3.bf16.msra.mxu0 %v2505_v34  ;;  %v2510_v39 = vld [vmem:[#allocation11 + $0x8] ss:$12 sps:$4 sm:$0xff]   ;;  %387 = vst.msk [vmem:[#allocation3 + $0x8] sm:$0xff] %vm385_vm0, %v2726_v40  ;;  %389 = vst.msk [vmem:[#allocation3 + $0x18] sm:$0xff] %vm385_vm0, %v2726_v40  ;;  %v997_v41 = vld [vmem:[#allocation12] sm:$0xff] }
 0x126   :  { %v2345_v42 = vpop.f32.mrf.mxu1  ;;  %v2131_v59 = vpack.c.bf16 %v2310_v57, %v2309_v53  ;;  %390 = vst.msk [vmem:[#allocation3 + $0x20] sm:$0xff] %vm385_vm0, %v2726_v40  ;;  %391 = vst.msk [vmem:[#allocation3 + $0x28] sm:$0xff] %vm385_vm0, %v2726_v40  ;;  %vm1001_vm1 = vnez %v997_v41 }
 0x127   :  { %v261_v61 = vpop.f32.mrf.mxu0  ;;  %v2496_v23 = vld [vmem:[#allocation2 + $0x8] sm:$0xff]   ;;  %392 = vst.msk [vmem:[#allocation3 + $0x30] sm:$0xff] %vm385_vm0, %v2726_v40  ;;  %393 = vst.msk [vmem:[#allocation3 + $0x38] sm:$0xff] %vm385_vm0, %v2726_v40 }
 0x128   :  { %v628_v44 = vpop.f32.mrf.mxu1  ;;  %2195 = vst [vmem:[#allocation2 + $0x18] sm:$0xff] %v2131_v59   ;;  %v2126_v63 = vpack.c.bf16 %v261_v61, %v258_v55  ;;  %394 = vst.msk [vmem:[#allocation3 + $0x40] sm:$0xff] %vm385_vm0, %v2726_v40 }
 0x129   :  { %v2495_v0 = vld [vmem:[#allocation2] sm:$0xff]   ;;  %v2313_v1 = vpop.f32.mrf.mxu0  ;;  %395 = vst.msk [vmem:[#allocation3 + $0x48] sm:$0xff] %vm385_vm0, %v2726_v40  ;;  %396 = vst.msk [vmem:[#allocation3 + $0x50] sm:$0xff] %vm385_vm0, %v2726_v40 }
 0x12a   :  { %v2346_v46 = vpop.f32.mrf.mxu1  ;;  %2194 = vst [vmem:[#allocation2 + $0x10] sm:$0xff] %v2126_v63   ;;  %2399 = vmatprep.mubr.bf16.mxu1 %v2495_v0  ;;  %397 = vst.msk [vmem:[#allocation3 + $0x58] sm:$0xff] %vm385_vm0, %v2726_v40 }
 0x12b   :  { %v274_v2 = vpop.f32.mrf.mxu0  ;;  %v664_v6 = vpack.c.bf16 %v2346_v46, %v2345_v42  ;;  %398 = vst.msk [vmem:[#allocation3 + $0x60] sm:$0xff] %vm385_vm0, %v2726_v40  ;;  %399 = vst.msk [vmem:[#allocation3 + $0x68] sm:$0xff] %vm385_vm0, %v2726_v40  ;;  %v1005_v42 = vsel %vm1001_vm1, 16843009, %v2725_v31 }
 0x12c   :  { %v631_v49 = vpop.f32.mrf.mxu1  ;;  %400 = vst.msk [vmem:[#allocation3 + $0x70] sm:$0xff] %vm385_vm0, %v2726_v40  ;;  %401 = vst.msk [vmem:[#allocation3 + $0x78] sm:$0xff] %vm385_vm0, %v2726_v40  ;;  %v1011_v43 = vunpack.c.2.s8 %v1005_v42  ;;  %v1010_v47 = vunpack.c.1.s8 %v1005_v42 }
 0x12d   :  { %v2314_v3 = vpop.f32.mrf.mxu0  ;;  %v663_v13 = vpack.c.bf16 %v631_v49, %v628_v44  ;;  %v1009_v44 = vunpack.c.0.s8 %v1005_v42 }
 0x12e   :  { %v2349_v52 = vpop.f32.mrf.mxu1  ;;  %v2141_v4 = vpack.c.bf16 %v2314_v3, %v2313_v1  ;;  %v1029_v46 = vpack.c.b16 %v1011_v43, %v1011_v43 }
 0x12f   :  { %v277_v5 = vpop.f32.mrf.mxu0  ;;  %v2498_v27 = vld [vmem:[#allocation2 + $0x18] sm:$0xff]  }
 0x130   :  { %v644_v54 = vpop.f32.mrf.mxu1  ;;  %2197 = vst [vmem:[#allocation2 + $0x28] sm:$0xff] %v2141_v4   ;;  %v2136_v7 = vpack.c.bf16 %v277_v5, %v274_v2  ;;  %v1000_v4 = vld [vmem:[#allocation12 + $0x18] sm:$0xff] }
 0x131   :  { %v2317_v8 = vpop.f32.mrf.mxu0  ;;  %v2497_v21 = vld [vmem:[#allocation2 + $0x10] sm:$0xff]   ;;  %vm1004_vm10 = vnez %v1000_v4 }
 0x132   :  { %v2350_v56 = vpop.f32.mrf.mxu1  ;;  %2196 = vst [vmem:[#allocation2 + $0x20] sm:$0xff] %v2136_v7  }
 0x133   :  { %v666_v58 = vpack.c.bf16 %v2350_v56, %v2349_v52  ;;  %v290_v9 = vpop.f32.mrf.mxu0  ;;  %v999_v52 = vld [vmem:[#allocation12 + $0x10] sm:$0xff] }
 0x134   :  { %v647_v60 = vpop.f32.mrf.mxu1  ;;  %vm1003_vm5 = vnez %v999_v52 }
 0x135   :  { %v665_v62 = vpack.c.bf16 %v647_v60, %v644_v54  ;;  %2383 = vmatprep.subr.bf16.mxu1 %v666_v58  ;;  %v2318_v10 = vpop.f32.mrf.mxu0  ;;  %v1007_v61 = vsel %vm1003_vm5, 16843009, %v2725_v31 }
 0x136   :  { %2384 = vmatpush3.bf16.xpose.msra.mxu1 %v666_v58  ;;  %v2151_v11 = vpack.c.bf16 %v2318_v10, %v2317_v8  ;;  %v1017_v0 = vunpack.c.0.s8 %v1007_v61  ;;  %v1020_v7 = vunpack.c.3.s8 %v1007_v61  ;;  %v1019_v10 = vunpack.c.2.s8 %v1007_v61 }
 0x137   :  { %2385 = vmatprep.subr.bf16.mxu1 %v665_v62  ;;  %v293_v12 = vpop.f32.mrf.mxu0  ;;  %v2500_v28 = vld [vmem:[#allocation2 + $0x28] sm:$0xff]  }
 0x138   :  { %2199 = vst [vmem:[#allocation2 + $0x38] sm:$0xff] %v2151_v11   ;;  %v2146_v14 = vpack.c.bf16 %v293_v12, %v290_v9  ;;  %v1041_v9 = vpack.c.b16 %v1017_v0, %v1017_v0  ;;  %v1045_v33 = vpack.c.b16 %v1019_v10, %v1019_v10 }
 0x139   :  { %v2499_v25 = vld [vmem:[#allocation2 + $0x20] sm:$0xff]  }
 0x13a   :  { %2198 = vst [vmem:[#allocation2 + $0x30] sm:$0xff] %v2146_v14   ;;  %v1042_v32 = vpack.c.b8 %v1041_v9, %v1041_v9 }
 0x13e   :  { %2386 = vmatpush3.bf16.xpose.msra.mxu1 %v665_v62 }
 0x13f   :  { %2387 = vmatprep.subr.bf16.mxu1 %v664_v6  ;;  %v2502_v30 = vld [vmem:[#allocation2 + $0x38] sm:$0xff]  }
 0x141   :  { %v2501_v29 = vld [vmem:[#allocation2 + $0x30] sm:$0xff]  }
 0x146   :  { %2388 = vmatpush3.bf16.xpose.msra.mxu1 %v664_v6 }
 0x147   :  { %2389 = vmatprep.subr.bf16.mxu1 %v663_v13 }
 0x14e   :  { %2390 = vmatpush3.bf16.xpose.msra.mxu1 %v663_v13 }
 0x14f   :  { %2391 = vmatprep.subr.bf16.mxu1 %v662_v17 }
 0x156   :  { %2392 = vmatpush3.bf16.xpose.msra.mxu1 %v662_v17 }
 0x157   :  { %2393 = vmatprep.subr.bf16.mxu1 %v661_v18 }
 0x15e   :  { %2394 = vmatpush3.bf16.xpose.msra.mxu1 %v661_v18 }
 0x15f   :  { %2395 = vmatprep.subr.bf16.mxu1 %v2797_v35 }
 0x166   :  { %2396 = vmatpush3.bf16.xpose.msra.mxu1 %v2797_v35  ;;  %v2506_v35 = vld [vmem:[#allocation11 + $0x68] ss:$12 sps:$4 sm:$0xff]  }
 0x167   :  { %2397 = vmatprep.subr.bf16.mxu1 %v2799_v37  ;;  %2357 = vmatprep.subr.bf16.mxu0 %v2506_v35 }
 0x168   :  { %2358 = vmatpush3.bf16.msra.mxu0 %v2506_v35 }
 0x169   :  { %2359 = vmatprep.subr.bf16.mxu0 %v2507_v36 }
 0x16c   :  { %2360 = vmatpush3.bf16.msra.mxu0 %v2507_v36 }
 0x16e   :  { %2398 = vmatpush3.bf16.xpose.msra.mxu1 %v2799_v37  ;;  %v2508_v37 = vld [vmem:[#allocation11 + $0x38] ss:$12 sps:$4 sm:$0xff]  }
 0x16f   :  { %2361 = vmatprep.subr.bf16.mxu0 %v2508_v37 }
 0x170   :  { %2362 = vmatpush3.bf16.msra.mxu0 %v2508_v37 }
 0x171   :  { %2363 = vmatprep.subr.bf16.mxu0 %v2509_v38 }
 0x174   :  { %2364 = vmatpush3.bf16.msra.mxu0 %v2509_v38 }
 0x175   :  { %2400 = vmatmul.mubr.bf16.vlgmr.msra.gmra.mxu1 %v2496_v23  ;;  %2365 = vmatprep.subr.bf16.mxu0 %v2510_v39  ;;  %v1018_v23 = vunpack.c.1.s8 %v1007_v61 }
 0x176   :  { %2403 = vmatprep.mubr.bf16.mxu1 %v2497_v21  ;;  %v1047_v21 = vpack.c.b16 %v1020_v7, %v1020_v7 }
 0x177   :  { %v1043_v41 = vpack.c.b16 %v1018_v23, %v1018_v23 }
 0x178   :  { %2366 = vmatpush3.bf16.msra.mxu0 %v2510_v39  ;;  %v1048_v40 = vpack.c.b8 %v1047_v21, %v1047_v21 }
 0x17b   :  { %2368 = vmatmul.mubr.bf16.vlgmr.msra.gmra.mxu0 %v2775_v15  ;;  %v1012_v15 = vunpack.c.3.s8 %v1005_v42 }
 0x17c   :  { %2371 = vmatprep.mubr.bf16.mxu0 %v2777_v16  ;;  %v1025_v16 = vpack.c.b16 %v1009_v44, %v1009_v44 }
 0x17d   :  { %2404 = vmatmul.mubr.bf16.gmra.mxu1 %v2498_v27 }
 0x17e   :  { %2407 = vmatprep.mubr.bf16.mxu1 %v2499_v25  ;;  %v1026_v48 = vpack.c.b8 %v1025_v16, %v1025_v16 }
 0x180   :  { %vm1057_vm4 = vnez %v1026_v48 }
 0x181   :  { %v1073_v58 = vsel %vm1057_vm4, 16843009, %v2725_v31  ;;  %vm1068_vm4 = vnez %v1048_v40 }
 0x182   :  { %v1089_v1 = vunpack.c.0.s8 %v1073_v58  ;;  %v1084_v58 = vsel %vm1068_vm4, 16843009, %v2725_v31 }
 0x183   :  { %2372 = vmatmul.mubr.bf16.gmra.mxu0 %v2781_v19  ;;  %v1031_v19 = vpack.c.b16 %v1012_v15, %v1012_v15  ;;  %v1046_v15 = vpack.c.b8 %v1045_v33, %v1045_v33 }
 0x184   :  { %2375 = vmatprep.mubr.bf16.mxu0 %v2783_v20  ;;  %v1030_v20 = vpack.c.b8 %v1029_v46, %v1029_v46  ;;  %vm2837_vm11 = vcmp.ne.s32.totalorder %v1089_v1, 0 }
 0x185   :  { %2408 = vmatmul.mubr.bf16.gmra.mxu1 %v2500_v28  ;;  %v1008_v28 = vsel %vm1004_vm10, 16843009, %v2725_v31 }
 0x186   :  { %2411 = vmatprep.mubr.bf16.mxu1 %v2501_v29  ;;  %vm1059_vm3 = vnez %v1030_v20  ;;  %v1021_v34 = vunpack.c.0.s8 %v1008_v28  ;;  %v1024_v42 = vunpack.c.3.s8 %v1008_v28  ;;  %v1023_v16 = vunpack.c.2.s8 %v1008_v28 }
 0x187   :  { %v1075_v55 = vsel %vm1059_vm3, 16843009, %v2725_v31 }
 0x188   :  { %v1091_v62 = vunpack.c.0.s8 %v1075_v55  ;;  %v1049_v46 = vpack.c.b16 %v1021_v34, %v1021_v34  ;;  %v1053_v55 = vpack.c.b16 %v1023_v16, %v1023_v16 }
 0x18a   :  { %vm1107_vm9 = vcmp.ne.s32.totalorder %v1091_v62, 0 }
 0x18b   :  { %2376 = vmatmul.mubr.bf16.gmra.mxu0 %v2787_v22  ;;  %v1006_v22 = vsel %vm1002_vm2, 16843009, %v2725_v31  ;;  %vm1065_vm2 = vnez %v1042_v32 }
 0x18c   :  { %2379 = vmatprep.mubr.bf16.mxu0 %v2789_v24  ;;  %v1027_v24 = vpack.c.b16 %v1010_v47, %v1010_v47  ;;  %v1013_v49 = vunpack.c.0.s8 %v1006_v22  ;;  %v1016_v50 = vunpack.c.3.s8 %v1006_v22  ;;  %v1015_v51 = vunpack.c.2.s8 %v1006_v22 }
 0x18d   :  { %2412 = vmatmul.mubr.bf16.gmra.mxu1 %v2502_v30  ;;  %v1014_v59 = vunpack.c.1.s8 %v1006_v22 }
 0x18e   :  { %v1028_v53 = vpack.c.b8 %v1027_v24, %v1027_v24  ;;  %v1033_v54 = vpack.c.b16 %v1013_v49, %v1013_v49  ;;  %v1039_v56 = vpack.c.b16 %v1016_v50, %v1016_v50  ;;  %v1037_v57 = vpack.c.b16 %v1015_v51, %v1015_v51 }
 0x18f   :  { %v1035_v6 = vpack.c.b16 %v1014_v59, %v1014_v59  ;;  %v1044_v24 = vpack.c.b8 %v1043_v41, %v1043_v41  ;;  %v1055_v49 = vpack.c.b16 %v1024_v42, %v1024_v42  ;;  %v1081_v51 = vsel %vm1065_vm2, 16843009, %v2725_v31 }
 0x190   :  { %vm1058_vm7 = vnez %v1028_v53  ;;  %v1034_v60 = vpack.c.b8 %v1033_v54, %v1033_v54  ;;  %v1040_v2 = vpack.c.b8 %v1039_v56, %v1039_v56  ;;  %v1038_v3 = vpack.c.b8 %v1037_v57, %v1037_v57 }
 0x191   :  { %v1074_v5 = vsel %vm1058_vm7, 16843009, %v2725_v31  ;;  %v1036_v18 = vpack.c.b8 %v1035_v6, %v1035_v6  ;;  %v1050_v54 = vpack.c.b8 %v1049_v46, %v1049_v46  ;;  %v1056_v61 = vpack.c.b8 %v1055_v49, %v1055_v49 }
 0x192   :  { %vm1061_vm8 = vnez %v1034_v60  ;;  %v1090_v12 = vunpack.c.0.s8 %v1074_v5  ;;  %vm1064_vm12 = vnez %v1040_v2  ;;  %vm2841_vm13 = vnez %v1038_v3 }
 0x193   :  { %2380 = vmatmul.mubr.bf16.gmra.mxu0 %v2793_v26  ;;  %v1032_v26 = vpack.c.b8 %v1031_v19, %v1031_v19  ;;  %v1077_v17 = vsel %vm1061_vm8, 16843009, %v2725_v31  ;;  %v1080_v30 = vsel %vm1064_vm12, 16843009, %v2725_v31  ;;  %v1079_v38 = vsel %vm2841_vm13, 16843009, %v2725_v31 }
 0x194   :  { %vm2859_vm15 = vcmp.ne.s32.totalorder %v1090_v12, 0  ;;  %v1093_v37 = vunpack.c.0.s8 %v1077_v17  ;;  %vm1062_vm1 = vnez %v1036_v18  ;;  %v1096_v44 = vunpack.c.0.s8 %v1080_v30 }
 0x195   :  { %vm1060_vm6 = vnez %v1032_v26  ;;  %v1095_v20 = vunpack.c.0.s8 %v1079_v38  ;;  %v1078_v22 = vsel %vm1062_vm1, 16843009, %v2725_v31  ;;  %v1022_v26 = vunpack.c.1.s8 %v1008_v28 }
 0x196   :  { %v1076_v63 = vsel %vm1060_vm6, 16843009, %v2725_v31  ;;  %vm2876_vm3 = vcmp.ne.s32.totalorder %v1093_v37, 0  ;;  %vm2882_vm5 = vcmp.ne.s32.totalorder %v1096_v44, 0  ;;  %v1094_v53 = vunpack.c.0.s8 %v1078_v22 }
 0x197   :  { %v1092_v8 = vunpack.c.0.s8 %v1076_v63  ;;  %vm1067_vm6 = vnez %v1046_v15  ;;  %vm2891_vm7 = vcmp.ne.s32.totalorder %v1095_v20, 0  ;;  %v1097_v60 = vunpack.c.0.s8 %v1081_v51 }
 0x198   :  { %vm1066_vm8 = vnez %v1044_v24  ;;  %v1051_v62 = vpack.c.b16 %v1022_v26, %v1022_v26  ;;  %v1083_v0 = vsel %vm1067_vm6, 16843009, %v2725_v31  ;;  %v1100_v2 = vunpack.c.0.s8 %v1084_v58 }
 0x199   :  { %vm2848_vm14 = vcmp.ne.s32.totalorder %v1092_v8, 0  ;;  %vm1069_vm10 = vnez %v1050_v54  ;;  %v1054_v3 = vpack.c.b8 %v1053_v55, %v1053_v55  ;;  %v1082_v5 = vsel %vm1066_vm8, 16843009, %v2725_v31 }
 0x19a   :  { %v1099_v7 = vunpack.c.0.s8 %v1083_v0  ;;  %vm1072_vm12 = vnez %v1056_v61  ;;  %v1052_v8 = vpack.c.b8 %v1051_v62, %v1051_v62  ;;  %v1085_v10 = vsel %vm1069_vm10, 16843009, %v2725_v31  ;;  %v2972_v62 = vld [vmem:[#allocation3] sm:$0xff] }
 0x19b   :  { %vm1116_vm13 = vcmp.ne.s32.totalorder %v1100_v2, 0  ;;  %v1098_v12 = vunpack.c.0.s8 %v1082_v5  ;;  %v1101_v18 = vunpack.c.0.s8 %v1085_v10  ;;  %v2727_v37 = vmov 0.0   ;;  %v2977_v2 = vld [vmem:[#allocation3 + $0x18] sm:$0xff] }
 0x19c   :  { %vm1070_vm1 = vnez %v1052_v8  ;;  %404 = vst.msk [vmem:[#allocation4 + $0x10] sm:$0xff] %vm385_vm0, %v2727_v37  ;;  %402 = vst.msk [vmem:[#allocation4] sm:$0xff] %vm385_vm0, %v2727_v37  ;;  %v2987_v8 = vld [vmem:[#allocation3 + $0x8] sm:$0xff] }
 0x19d   :  { %vm1114_vm2 = vcmp.ne.s32.totalorder %v1098_v12, 0  ;;  %v1086_v30 = vsel %vm1070_vm1, 16843009, %v2725_v31  ;;  %403 = vst.msk [vmem:[#allocation4 + $0x8] sm:$0xff] %vm385_vm0, %v2727_v37  ;;  %405 = vst.msk [vmem:[#allocation4 + $0x18] sm:$0xff] %vm385_vm0, %v2727_v37 }
 0x19e   :  { %406 = vst.msk [vmem:[#allocation4 + $0x20] sm:$0xff] %vm385_vm0, %v2727_v37  ;;  %407 = vst.msk [vmem:[#allocation4 + $0x28] sm:$0xff] %vm385_vm0, %v2727_v37  ;;  %v1102_v38 = vunpack.c.0.s8 %v1086_v30  ;;  %v3011_v30 = vld [vmem:[#allocation3 + $0x38] sm:$0xff] }
 0x19f   :  { %408 = vst.msk [vmem:[#allocation4 + $0x30] sm:$0xff] %vm385_vm0, %v2727_v37  ;;  %409 = vst.msk [vmem:[#allocation4 + $0x38] sm:$0xff] %vm385_vm0, %v2727_v37 }
 0x1a0   :  { %410 = vst.msk [vmem:[#allocation4 + $0x40] sm:$0xff] %vm385_vm0, %v2727_v37  ;;  %411 = vst.msk [vmem:[#allocation4 + $0x48] sm:$0xff] %vm385_vm0, %v2727_v37  ;;  %vm1118_vm6 = vcmp.ne.s32.totalorder %v1102_v38, 0 }
 0x1a1   :  { %412 = vst.msk [vmem:[#allocation4 + $0x50] sm:$0xff] %vm385_vm0, %v2727_v37  ;;  %413 = vst.msk [vmem:[#allocation4 + $0x58] sm:$0xff] %vm385_vm0, %v2727_v37 }
 0x1a2   :  { %414 = vst.msk [vmem:[#allocation4 + $0x60] sm:$0xff] %vm385_vm0, %v2727_v37  ;;  %415 = vst.msk [vmem:[#allocation4 + $0x68] sm:$0xff] %vm385_vm0, %v2727_v37 }
 0x1a3   :  { %416 = vst.msk [vmem:[#allocation4 + $0x70] sm:$0xff] %vm385_vm0, %v2727_v37  ;;  %417 = vst.msk [vmem:[#allocation4 + $0x78] sm:$0xff] %vm385_vm0, %v2727_v37  ;;  %v3017_v37 = vld [vmem:[#allocation3 + $0x30] sm:$0xff] }
 0x235   :  { %v2401_v14 = vpop.f32.mrf.mxu1 }
 0x236   :  { %v2846_v25 = vsel %vm1107_vm9, -1e+30, %v2401_v14  ;;  %vm1110_vm9 = vcmp.ne.s32.totalorder %v1094_v53, 0  ;;  %v1088_v14 = vsel %vm1072_vm12, 16843009, %v2725_v31 }
 0x237   :  { %1157 = vmax.xlane.f32.xlu1 %v2846_v25  ;;  %v934_v29 = vpop.f32.mrf.mxu1  ;;  %v1104_v28 = vunpack.c.0.s8 %v1088_v14 }
 0x238   :  { %v2857_v35 = vsel %vm2837_vm11, -1e+30, %v934_v29  ;;  %vm1113_vm11 = vcmp.ne.s32.totalorder %v1097_v60, 0 }
 0x239   :  { %1153 = vmax.xlane.f32.xlu0 %v2857_v35  ;;  %v2402_v39 = vpop.f32.mrf.mxu1  ;;  %vm1120_vm4 = vcmp.ne.s32.totalorder %v1104_v28, 0 }
 0x23a   :  { %v2869_v43 = vsel %vm2848_vm14, -1e+30, %v2402_v39  ;;  %vm1071_vm14 = vnez %v1054_v3 }
 0x23b   :  { %1159 = vmax.xlane.f32.xlu1 %v2869_v43  ;;  %v937_v45 = vpop.f32.mrf.mxu1  ;;  %v1087_v23 = vsel %vm1071_vm14, 16843009, %v2725_v31  ;;  %v2962_v15 = vpop.f32.mrf.mxu0 }
 0x23c   :  { %v2874_v47 = vsel %vm2859_vm15, -1e+30, %v937_v45  ;;  %vm1115_vm15 = vcmp.ne.s32.totalorder %v1099_v7, 0  ;;  %v1103_v34 = vunpack.c.0.s8 %v1087_v23  ;;  %v3005_v23 = vld [vmem:[#allocation3 + $0x20] sm:$0xff] }
 0x23d   :  { %1155 = vmax.xlane.f32.xlu0 %v2874_v47  ;;  %v2405_v48 = vpop.f32.mrf.mxu1  ;;  %v2964_v46 = vpop.f32.mrf.mxu0 }
 0x23e   :  { %v2905_v4 = vsel %vm2891_vm7, -1e+30, %v2405_v48 }
 0x23f   :  { %v950_v52 = vpop.f32.mrf.mxu1  ;;  %v2966_v16 = vpop.f32.mrf.mxu0 }
 0x240   :  { %v2889_v56 = vsel %vm2876_vm3, -1e+30, %v950_v52  ;;  %vm2925_vm3 = vcmp.ne.s32.totalorder %v1101_v18, 0 }
 0x241   :  { %1161 = vmax.xlane.f32.xlu0 %v2889_v56  ;;  %v2406_v59 = vpop.f32.mrf.mxu1  ;;  %v2968_v19 = vpop.f32.mrf.mxu0 }
 0x242   :  { %v2899_v63 = vsel %vm2882_vm5, -1e+30, %v2406_v59  ;;  %vm1119_vm5 = vcmp.ne.s32.totalorder %v1103_v34, 0  ;;  %v2970_v59 = vld [vmem:[#allocation3 + $0x10] sm:$0xff] }
 0x243   :  { %1167 = vmax.xlane.f32.xlu1 %v2899_v63  ;;  %v953_v1 = vpop.f32.mrf.mxu1  ;;  %v2373_v20 = vpop.f32.mrf.mxu0 }
 0x244   :  { %v2909_v9 = vsel %vm1110_vm9, -1e+30, %v953_v1 }
 0x245   :  { %1165 = vmax.xlane.f32.xlu0 %v2905_v4  ;;  %v2409_v6 = vpop.f32.mrf.mxu1  ;;  %v781_v22 = vpop.f32.mrf.mxu0 }
 0x246   :  { %v2921_v29 = vsel %vm1115_vm15, -1e+30, %v2409_v6 }
 0x247   :  { %1163 = vmax.xlane.f32.xlu1 %v2909_v9  ;;  %v966_v11 = vpop.f32.mrf.mxu1  ;;  %v2374_v48 = vpop.f32.mrf.mxu0 }
 0x248   :  { %v2913_v13 = vsel %vm1113_vm11, -1e+30, %v966_v11  ;;  %v831_v14 = vpack.c.bf16 %v2374_v48, %v2373_v20  ;;  %v829_v20 = vpack.c.bf16 %v2966_v16, %v2962_v15 }
 0x249   :  { %1169 = vmax.xlane.f32.xlu0 %v2913_v13  ;;  %v2410_v17 = vpop.f32.mrf.mxu1  ;;  %v784_v24 = vpop.f32.mrf.mxu0 }
 0x24a   :  { %v2917_v21 = vsel %vm1116_vm13, -1e+30, %v2410_v17 }
 0x24b   :  { %1175 = vmax.xlane.f32.xlu1 %v2917_v21  ;;  %v969_v27 = vpop.f32.mrf.mxu1  ;;  %v2377_v49 = vpop.f32.mrf.mxu0 }
 0x24c   :  { %v2929_v36 = vsel %vm1114_vm2, -1e+30, %v969_v27 }
 0x24d   :  { %1173 = vmax.xlane.f32.xlu0 %v2921_v29  ;;  %v2413_v32 = vpop.f32.mrf.mxu1  ;;  %v797_v26 = vpop.f32.mrf.mxu0 }
 0x24e   :  { %v2956_v44 = vsel %vm1119_vm5, -1e+30, %v2413_v32  ;;  %v830_v32 = vpack.c.bf16 %v784_v24, %v781_v22 }
 0x24f   :  { %1171 = vmax.xlane.f32.xlu1 %v2929_v36  ;;  %v982_v31 = vpop.f32.mrf.mxu1  ;;  %v2378_v50 = vpop.f32.mrf.mxu0 }
 0x250   :  { %v2950_v39 = vsel %vm2925_vm3, -1e+30, %v982_v31  ;;  %v833_v60 = vpack.c.bf16 %v2378_v50, %v2377_v49  ;;  %v3037_v49 = vld [vmem:[#allocation3 + $0x40] sm:$0xff]  ;;  %v3047_v50 = vld [vmem:[#allocation3 + $0x58] sm:$0xff] }
 0x251   :  { %1177 = vmax.xlane.f32.xlu0 %v2950_v39  ;;  %v2414_v40 = vpop.f32.mrf.mxu1  ;;  %v800_v51 = vpop.f32.mrf.mxu0 }
 0x252   :  { %v2953_v41 = vsel %vm1120_vm4, -1e+30, %v2414_v40  ;;  %v832_v3 = vpack.c.bf16 %v800_v51, %v797_v26  ;;  %v828_v51 = vpack.c.bf16 %v2968_v19, %v2964_v46 }
 0x253   :  { %1183 = vmax.xlane.f32.xlu1 %v2953_v41  ;;  %v985_v42 = vpop.f32.mrf.mxu1  ;;  %v2381_v52 = vpop.f32.mrf.mxu0 }
 0x254   :  { %v2959_v45 = vsel %vm1118_vm6, -1e+30, %v985_v42  ;;  %v3026_v42 = vld [vmem:[#allocation3 + $0x28] sm:$0xff] }
 0x255   :  { %1181 = vmax.xlane.f32.xlu0 %v2956_v44  ;;  %v813_v53 = vpop.f32.mrf.mxu0 }
 0x257   :  { %1179 = vmax.xlane.f32.xlu1 %v2959_v45  ;;  %v2382_v54 = vpop.f32.mrf.mxu0 }
 0x258   :  { %v835_v55 = vpack.c.bf16 %v2382_v54, %v2381_v52 }
 0x259   :  { %v816_v57 = vpop.f32.mrf.mxu0 }
 0x25a   :  { %2415 = vmatprep.subr.bf16.mxu0 %v835_v55  ;;  %v834_v58 = vpack.c.bf16 %v816_v57, %v813_v53 }
 0x25b   :  { %2416 = vmatpush3.bf16.msra.mxu0 %v835_v55  ;;  %v3058_v55 = vld [vmem:[#allocation3 + $0x50] sm:$0xff] }
 0x25c   :  { %2417 = vmatprep.subr.bf16.mxu0 %v834_v58 }
 0x25f   :  { %2418 = vmatpush3.bf16.msra.mxu0 %v834_v58  ;;  %v3068_v58 = vld [vmem:[#allocation3 + $0x48] sm:$0xff] }
 0x260   :  { %2419 = vmatprep.subr.bf16.mxu0 %v833_v60 }
 0x263   :  { %2420 = vmatpush3.bf16.msra.mxu0 %v833_v60 }
 0x264   :  { %2421 = vmatprep.subr.bf16.mxu0 %v832_v3 }
 0x267   :  { %2422 = vmatpush3.bf16.msra.mxu0 %v832_v3  ;;  %v3077_v3 = vld [vmem:[#allocation3 + $0x60] sm:$0xff] }
 0x268   :  { %2423 = vmatprep.subr.bf16.mxu0 %v831_v14 }
 0x26b   :  { %2424 = vmatpush3.bf16.msra.mxu0 %v831_v14 }
 0x26c   :  { %2425 = vmatprep.subr.bf16.mxu0 %v830_v32 }
 0x26f   :  { %2426 = vmatpush3.bf16.msra.mxu0 %v830_v32 }
 0x270   :  { %2427 = vmatprep.subr.bf16.mxu0 %v829_v20 }
 0x273   :  { %2428 = vmatpush3.bf16.msra.mxu0 %v829_v20  ;;  %v3097_v20 = vld [vmem:[#allocation3 + $0x70] sm:$0xff] }
 0x274   :  { %2429 = vmatprep.subr.bf16.mxu0 %v828_v51 }
 0x277   :  { %2430 = vmatpush3.bf16.msra.mxu0 %v828_v51 }
 0x2c0   :  { %v1158_v61 = vpop.xlane.xlu1 %1157 }
 0x2c1   :  { %v2975_v0 = vmax.f32 %v2970_v59, %v1158_v61 }
 0x2c2   :  { %v1154_v1 = vpop.xlane.xlu0 %1153 }
 0x2c3   :  { %v1203_v5 = vsub.f32 %v2970_v59, %v2975_v0  ;;  %1741 = vst.msk [vmem:[#allocation3 + $0x10] sm:$0xff] %vm385_vm0, %v2975_v0  ;;  %v2984_v6 = vmax.f32 %v2972_v62, %v1154_v1  ;;  %1261 = vperm.xlu1 %2462, %v2975_v0  }
 0x2c4   :  { %v1160_v7 = vpop.xlane.xlu1 %1159 }
 0x2c5   :  { %1739 = vst.msk [vmem:[#allocation3] sm:$0xff] %vm385_vm0, %v2984_v6  ;;  %v2994_v11 = vmax.f32 %v2977_v2, %v1160_v7  ;;  %1251 = vperm.xlu0 %2461, %v2984_v6  }
 0x2c6   :  { %v1156_v12 = vpop.xlane.xlu0 %1155 }
 0x2c7   :  { %1742 = vst.msk [vmem:[#allocation3 + $0x18] sm:$0xff] %vm385_vm0, %v2994_v11  ;;  %v3002_v18 = vmax.f32 %v2987_v8, %v1156_v12  ;;  %1266 = vperm.xlu1 %2462, %v2994_v11  }
 0x2c9   :  { %v1202_v27 = vsub.f32 %v2987_v8, %v3002_v18  ;;  %1740 = vst.msk [vmem:[#allocation3 + $0x8] sm:$0xff] %vm385_vm0, %v3002_v18  ;;  %v3301_v8 = vsub.f32 %v2977_v2, %v2994_v11 }
 0x2ca   :  { %v1162_v28 = vpop.xlane.xlu0 %1161 }
 0x2cb   :  { %v3014_v33 = vmax.f32 %v3005_v23, %v1162_v28  ;;  %1256 = vperm.xlu1 %2462, %v3002_v18   ;;  %v3087_v28 = vld [vmem:[#allocation3 + $0x78] sm:$0xff]  ;;  %v1223_v18 = vmul.f32 1.442695, %v3301_v8 }
 0x2cc   :  { %v1168_v34 = vpop.xlane.xlu1 %1167 }
 0x2cd   :  { %1743 = vst.msk [vmem:[#allocation3 + $0x20] sm:$0xff] %vm385_vm0, %v3014_v33  ;;  %v3024_v38 = vmax.f32 %v3011_v30, %v1168_v34 }
 0x2ce   :  { %v1166_v40 = vpop.xlane.xlu0 %1165 }
 0x2cf   :  { %1746 = vst.msk [vmem:[#allocation3 + $0x38] sm:$0xff] %vm385_vm0, %v3024_v38  ;;  %v3035_v48 = vmax.f32 %v3017_v37, %v1166_v40  ;;  %v3305_v2 = vsub.f32 %v3011_v30, %v3024_v38 }
 0x2d0   :  { %v1164_v24 = vpop.xlane.xlu1 %1163 }
 0x2d1   :  { %1745 = vst.msk [vmem:[#allocation3 + $0x30] sm:$0xff] %vm385_vm0, %v3035_v48  ;;  %v3044_v15 = vmax.f32 %v3026_v42, %v1164_v24  ;;  %1281 = vperm.xlu1 %2462, %v3035_v48   ;;  %v3302_v59 = vsub.f32 %v3017_v37, %v3035_v48  ;;  %v1231_v11 = vmul.f32 1.442695, %v3305_v2 }
 0x2d2   :  { %v1170_v16 = vpop.xlane.xlu0 %1169 }
 0x2d3   :  { %1744 = vst.msk [vmem:[#allocation3 + $0x28] sm:$0xff] %vm385_vm0, %v3044_v15  ;;  %v3056_v53 = vmax.f32 %v3037_v49, %v1170_v16  ;;  %v1229_v0 = vmul.f32 1.442695, %v3302_v59  ;;  %v1389_v59 = vld [vmem:[#allocation4 + $0x20] sm:$0xff] }
 0x2d4   :  { %v1176_v54 = vpop.xlane.xlu1 %1175 }
 0x2d5   :  { %1747 = vst.msk [vmem:[#allocation3 + $0x40] sm:$0xff] %vm385_vm0, %v3056_v53  ;;  %v3065_v46 = vmax.f32 %v3047_v50, %v1176_v54  ;;  %1271 = vperm.xlu1 %2462, %v3014_v33   ;;  %v3107_v54 = vld [vmem:[#allocation3 + $0x68] sm:$0xff] }
 0x2d6   :  { %v1174_v19 = vpop.xlane.xlu0 %1173 }
 0x2d7   :  { %1750 = vst.msk [vmem:[#allocation3 + $0x58] sm:$0xff] %vm385_vm0, %v3065_v46  ;;  %v3075_v61 = vmax.f32 %v3058_v55, %v1174_v19 }
 0x2d8   :  { %v1172_v1 = vpop.xlane.xlu1 %1171 }
 0x2d9   :  { %1749 = vst.msk [vmem:[#allocation3 + $0x50] sm:$0xff] %vm385_vm0, %v3075_v61  ;;  %v3084_v12 = vmax.f32 %v3068_v58, %v1172_v1  ;;  %1276 = vperm.xlu1 %2462, %v3044_v15  }
 0x2da   :  { %v1178_v14 = vpop.xlane.xlu0 %1177 }
 0x2db   :  { %1748 = vst.msk [vmem:[#allocation3 + $0x48] sm:$0xff] %vm385_vm0, %v3084_v12  ;;  %v3094_v34 = vmax.f32 %v3077_v3, %v1178_v14  ;;  %1296 = vperm.xlu0 %2461, %v3084_v12  }
 0x2dc   :  { %v1184_v40 = vpop.xlane.xlu1 %1183 }
 0x2dd   :  { %1751 = vst.msk [vmem:[#allocation3 + $0x60] sm:$0xff] %vm385_vm0, %v3094_v34  ;;  %v3104_v16 = vmax.f32 %v3087_v28, %v1184_v40  ;;  %1286 = vperm.xlu1 %2462, %v3024_v38   ;;  %v3308_v30 = vsub.f32 %v3077_v3, %v3094_v34 }
 0x2de   :  { %v1182_v51 = vpop.xlane.xlu0 %1181 }
 0x2df   :  { %1754 = vst.msk [vmem:[#allocation3 + $0x78] sm:$0xff] %vm385_vm0, %v3104_v16  ;;  %v3114_v1 = vmax.f32 %v3097_v20, %v1182_v51  ;;  %1306 = vperm.xlu0 %2461, %v3065_v46   ;;  %v1241_v38 = vmul.f32 1.442695, %v3308_v30 }
 0x2e0   :  { %v1180_v14 = vpop.xlane.xlu1 %1179 }
 0x2e1   :  { %1753 = vst.msk [vmem:[#allocation3 + $0x70] sm:$0xff] %vm385_vm0, %v3114_v1  ;;  %v3122_v60 = vmax.f32 %v3107_v54, %v1180_v14  ;;  %1291 = vperm.xlu1 %2462, %v3056_v53  }
 0x2e3   :  { %1752 = vst.msk [vmem:[#allocation3 + $0x68] sm:$0xff] %vm385_vm0, %v3122_v60  ;;  %1316 = vperm.xlu0 %2461, %v3122_v60   ;;  %v3311_v3 = vsub.f32 %v3107_v54, %v3122_v60 }
 0x2e5   :  { %1301 = vperm.xlu1 %2462, %v3075_v61  }
 0x2e7   :  { %1326 = vperm.xlu0 %2461, %v3104_v16  }
 0x2e9   :  { %1311 = vperm.xlu1 %2462, %v3094_v34   ;;  %v1243_v34 = vmul.f32 1.442695, %v3311_v3 }
 0x2ed   :  { %1321 = vperm.xlu1 %2462, %v3114_v1  }
 0x33e   :  { %v1262_v51 = vpop.permute.xlu1 %1261 }
 0x33f   :  { %v1331_v14 = vsub.f32 %v2846_v25, %v1262_v51 }
 0x340   :  { %v1252_v40 = vpop.permute.xlu0 %1251 }
 0x341   :  { %v1349_v24 = vmul.f32 1.442695, %v1331_v14  ;;  %v1329_v19 = vsub.f32 %v2857_v35, %v1252_v40 }
 0x342   :  { %v1267_v32 = vpop.permute.xlu1 %1266 }
 0x343   :  { %v1332_v7 = vsub.f32 %v2869_v43, %v1267_v32  ;;  %2511 = vpow2.f32 %v1349_v24  ;;  %v1345_v57 = vmul.f32 1.442695, %v1329_v19 }
 0x345   :  { %v1351_v22 = vmul.f32 1.442695, %v1332_v7 }
 0x346   :  { %v1257_v52 = vpop.permute.xlu1 %1256 }
 0x347   :  { %2513 = vpow2.f32 %v1351_v22  ;;  %v1330_v26 = vsub.f32 %v2874_v47, %v1257_v52 }
 0x348   :  { %2515 = vpow2.f32 %v1345_v57 }
 0x349   :  { %v1347_v17 = vmul.f32 1.442695, %v1330_v26 }
 0x34b   :  { %2517 = vpow2.f32 %v1347_v17 }
 0x34c   :  { %v1282_v31 = vpop.permute.xlu1 %1281 }
 0x34d   :  { %v1335_v35 = vsub.f32 %v2905_v4, %v1282_v31 }
 0x34f   :  { %v1357_v17 = vmul.f32 1.442695, %v1335_v35 }
 0x350   :  { %v1272_v10 = vpop.permute.xlu1 %1271  ;;  %v2512_v51 = vpop.eup %2511 }
 0x351   :  { %v1333_v25 = vsub.f32 %v2889_v56, %v1272_v10 }
 0x353   :  { %v1353_v40 = vmul.f32 1.442695, %v1333_v25 }
 0x354   :  { %v2514_v14 = vpop.eup %2513  ;;  %v1277_v43 = vpop.permute.xlu1 %1276 }
 0x355   :  { %v1334_v7 = vsub.f32 %v2909_v9, %v1277_v43  ;;  %v1378_v32 = vpack.c.bf16 %v2514_v14, %v2512_v51  ;;  %v2516_v22 = vpop.eup %2515  ;;  %2519 = vpow2.f32 %v1353_v40 }
 0x356   :  { %v1297_v24 = vpop.permute.xlu0 %1296 }
 0x357   :  { %v1355_v19 = vmul.f32 1.442695, %v1334_v7  ;;  %v1420_v47 = vunpack.c.h.bf16 %v1378_v32  ;;  %v1419_v26 = vunpack.c.l.bf16 %v1378_v32  ;;  %v1338_v57 = vsub.f32 %v2929_v36, %v1297_v24 }
 0x358   :  { %v2518_v52 = vpop.eup %2517  ;;  %v1287_v56 = vpop.permute.xlu1 %1286 }
 0x359   :  { %2521 = vpow2.f32 %v1355_v19  ;;  %v1336_v10 = vsub.f32 %v2899_v63, %v1287_v56  ;;  %1439 = vadd.xlane.f32.xlu1 %v1420_v47  ;;  %1437 = vadd.xlane.f32.xlu0 %v1419_v26  ;;  %v1377_v4 = vpack.c.bf16 %v2518_v52, %v2516_v22  ;;  %v1363_v51 = vmul.f32 1.442695, %v1338_v57 }
 0x35a   :  { %v1307_v31 = vpop.permute.xlu0 %1306  ;;  %2523 = vpow2.f32 %v1357_v17 }
 0x35b   :  { %v1359_v9 = vmul.f32 1.442695, %v1336_v10  ;;  %2431 = vmatprep.mubr.bf16.mxu0 %v1377_v4  ;;  %v1418_v25 = vunpack.c.h.bf16 %v1377_v4  ;;  %v1340_v14 = vsub.f32 %v2917_v21, %v1307_v31  ;;  %v1417_v40 = vunpack.c.l.bf16 %v1377_v4 }
 0x35c   :  { %2432 = vmatmul.mubr.bf16.vlgmr.msra.gmra.mxu0 %v1378_v32  ;;  %v1292_v35 = vpop.permute.xlu1 %1291 }
 0x35d   :  { %2525 = vpow2.f32 %v1359_v9  ;;  %v1337_v36 = vsub.f32 %v2913_v13, %v1292_v35  ;;  %1435 = vadd.xlane.f32.xlu0 %v1418_v25  ;;  %1433 = vadd.xlane.f32.xlu1 %v1417_v40  ;;  %v1367_v7 = vmul.f32 1.442695, %v1340_v14 }
 0x35e   :  { %v1317_v63 = vpop.permute.xlu0 %1316  ;;  %2527 = vpow2.f32 %v1363_v51 }
 0x35f   :  { %v1361_v43 = vmul.f32 1.442695, %v1337_v36  ;;  %v1342_v24 = vsub.f32 %v2959_v45, %v1317_v63 }
 0x360   :  { %v1302_v22 = vpop.permute.xlu1 %1301 }
 0x361   :  { %2529 = vpow2.f32 %v1361_v43  ;;  %v1339_v19 = vsub.f32 %v2921_v29, %v1302_v22  ;;  %v1371_v32 = vmul.f32 1.442695, %v1342_v24 }
 0x362   :  { %v1327_v47 = vpop.permute.xlu0 %1326  ;;  %2531 = vpow2.f32 %v1367_v7  ;;  %v2520_v13 = vpop.eup %2519 }
 0x363   :  { %v1365_v21 = vmul.f32 1.442695, %v1339_v19  ;;  %v1344_v26 = vsub.f32 %v2953_v41, %v1327_v47 }
 0x364   :  { %v1312_v52 = vpop.permute.xlu1 %1311 }
 0x365   :  { %2533 = vpow2.f32 %v1365_v21  ;;  %v1341_v17 = vsub.f32 %v2950_v39, %v1312_v52  ;;  %v1375_v45 = vmul.f32 1.442695, %v1344_v26 }
 0x366   :  { %v2522_v57 = vpop.eup %2521  ;;  %2535 = vpow2.f32 %v1371_v32 }
 0x367   :  { %v1369_v56 = vmul.f32 1.442695, %v1341_v17  ;;  %v1379_v10 = vpack.c.bf16 %v2522_v57, %v2520_v13  ;;  %v2524_v31 = vpop.eup %2523 }
 0x368   :  { %v1322_v4 = vpop.permute.xlu1 %1321 }
 0x369   :  { %2537 = vpow2.f32 %v1369_v56  ;;  %v1343_v29 = vsub.f32 %v2956_v44, %v1322_v4  ;;  %2435 = vmatprep.mubr.bf16.mxu0 %v1379_v10  ;;  %v1422_v63 = vunpack.c.h.bf16 %v1379_v10  ;;  %v1421_v43 = vunpack.c.l.bf16 %v1379_v10 }
 0x36a   :  { %v2526_v9 = vpop.eup %2525  ;;  %2539 = vpow2.f32 %v1375_v45  ;;  %v1219_v4 = vmul.f32 1.442695, %v1202_v27 }
 0x36b   :  { %v1373_v25 = vmul.f32 1.442695, %v1343_v29  ;;  %v1380_v51 = vpack.c.bf16 %v2526_v9, %v2524_v31  ;;  %v2528_v41 = vpop.eup %2527  ;;  %v1221_v31 = vmul.f32 1.442695, %v1203_v5  ;;  %v3299_v29 = vsub.f32 %v2972_v62, %v2984_v6 }
 0x36c   :  { %v3303_v62 = vsub.f32 %v3026_v42, %v3044_v15  ;;  %v3304_v6 = vsub.f32 %v3037_v49, %v3056_v53  ;;  %v3307_v42 = vsub.f32 %v3068_v58, %v3084_v12  ;;  %v3310_v58 = vsub.f32 %v3097_v20, %v3114_v1 }
 0x36d   :  { %2541 = vpow2.f32 %v1373_v25  ;;  %2436 = vmatmul.mubr.bf16.gmra.mxu0 %v1380_v51  ;;  %v1424_v14 = vunpack.c.h.bf16 %v1380_v51  ;;  %v1423_v39 = vunpack.c.l.bf16 %v1380_v51  ;;  %v1217_v9 = vmul.f32 1.442695, %v3299_v29  ;;  %v1391_v29 = vld [vmem:[#allocation4 + $0x30] sm:$0xff] }
 0x36e   :  { %v2530_v35 = vpop.eup %2529  ;;  %2543 = vpow2.f32 %v1219_v4  ;;  %v3300_v25 = vsub.f32 %v3005_v23, %v3014_v33  ;;  %v1227_v5 = vmul.f32 1.442695, %v3303_v62  ;;  %v1233_v23 = vmul.f32 1.442695, %v3304_v6 }
 0x36f   :  { %1447 = vadd.xlane.f32.xlu1 %v1424_v14  ;;  %1445 = vadd.xlane.f32.xlu0 %v1423_v39  ;;  %v1381_v40 = vpack.c.bf16 %v2528_v41, %v2530_v35  ;;  %v2532_v36 = vpop.eup %2531  ;;  %2545 = vpow2.f32 %v1221_v31  ;;  %v3306_v33 = vsub.f32 %v3058_v55, %v3075_v61  ;;  %v1235_v15 = vmul.f32 1.442695, %v3307_v42 }
 0x370   :  { %v1225_v51 = vmul.f32 1.442695, %v3300_v25  ;;  %2547 = vpow2.f32 %v1217_v9  ;;  %v3309_v55 = vsub.f32 %v3047_v50, %v3065_v46  ;;  %v1245_v12 = vmul.f32 1.442695, %v3310_v58  ;;  %v1392_v9 = vld [vmem:[#allocation4 + $0x38] sm:$0xff]  ;;  %v1394_v58 = vld [vmem:[#allocation4 + $0x48] sm:$0xff] }
 0x371   :  { %2439 = vmatprep.mubr.bf16.mxu0 %v1381_v40  ;;  %v1426_v26 = vunpack.c.h.bf16 %v1381_v40  ;;  %v1425_v52 = vunpack.c.l.bf16 %v1381_v40  ;;  %v1237_v37 = vmul.f32 1.442695, %v3306_v33  ;;  %v3312_v46 = vsub.f32 %v3087_v28, %v3104_v16 }
 0x372   :  { %v2534_v7 = vpop.eup %2533  ;;  %2549 = vpow2.f32 %v1225_v51  ;;  %v1239_v61 = vmul.f32 1.442695, %v3309_v55 }
 0x373   :  { %1443 = vadd.xlane.f32.xlu1 %v1422_v63  ;;  %1441 = vadd.xlane.f32.xlu0 %v1421_v43  ;;  %v1382_v44 = vpack.c.bf16 %v2532_v36, %v2534_v7  ;;  %v2536_v24 = vpop.eup %2535  ;;  %2551 = vpow2.f32 %v1223_v18  ;;  %v1247_v35 = vmul.f32 1.442695, %v3312_v46  ;;  %v1387_v63 = vld [vmem:[#allocation4 + $0x10] sm:$0xff]  ;;  %v1388_v43 = vld [vmem:[#allocation4 + $0x18] sm:$0xff] }
 0x374   :  { %2553 = vpow2.f32 %v1229_v0  ;;  %v1390_v0 = vld [vmem:[#allocation4 + $0x28] sm:$0xff] }
 0x375   :  { %2440 = vmatmul.mubr.bf16.gmra.mxu0 %v1382_v44  ;;  %v1428_v22 = vunpack.c.h.bf16 %v1382_v44  ;;  %v1427_v19 = vunpack.c.l.bf16 %v1382_v44  ;;  %2555 = vpow2.f32 %v1227_v5 }
 0x376   :  { %v2538_v47 = vpop.eup %2537  ;;  %2557 = vpow2.f32 %v1233_v23 }
 0x377   :  { %1455 = vadd.xlane.f32.xlu1 %v1428_v22  ;;  %1453 = vadd.xlane.f32.xlu0 %v1427_v19  ;;  %v1383_v21 = vpack.c.bf16 %v2536_v24, %v2538_v47  ;;  %v2540_v32 = vpop.eup %2539  ;;  %2559 = vpow2.f32 %v1231_v11  ;;  %v1386_v19 = vld [vmem:[#allocation4 + $0x8] sm:$0xff] }
 0x378   :  { %2561 = vpow2.f32 %v1237_v37  ;;  %v1395_v37 = vld [vmem:[#allocation4 + $0x50] sm:$0xff] }
 0x379   :  { %2443 = vmatprep.mubr.bf16.mxu0 %v1383_v21  ;;  %v1429_v57 = vunpack.c.l.bf16 %v1383_v21  ;;  %v1430_v10 = vunpack.c.h.bf16 %v1383_v21  ;;  %2563 = vpow2.f32 %v1235_v15 }
 0x37a   :  { %v2542_v13 = vpop.eup %2541  ;;  %2565 = vpow2.f32 %v1241_v38 }
 0x37b   :  { %1451 = vadd.xlane.f32.xlu1 %v1426_v26  ;;  %1449 = vadd.xlane.f32.xlu0 %v1425_v52  ;;  %v1384_v17 = vpack.c.bf16 %v2540_v32, %v2542_v13  ;;  %v2544_v27 = vpop.eup %2543  ;;  %2567 = vpow2.f32 %v1239_v61  ;;  %v1385_v32 = vld [vmem:[#allocation4] sm:$0xff] }
 0x37c   :  { %v2546_v48 = vpop.eup %2545  ;;  %2569 = vpow2.f32 %v1245_v12  ;;  %v1402_v26 = vmul.f32 %v2544_v27, %v1386_v19  ;;  %v1399_v19 = vld [vmem:[#allocation4 + $0x70] sm:$0xff] }
 0x37d   :  { %2444 = vmatmul.mubr.bf16.gmra.mxu0 %v1384_v17  ;;  %v1432_v56 = vunpack.c.h.bf16 %v1384_v17  ;;  %v1431_v45 = vunpack.c.l.bf16 %v1384_v17  ;;  %v2548_v49 = vpop.eup %2547  ;;  %2571 = vpow2.f32 %v1243_v34  ;;  %v1403_v7 = vmul.f32 %v2546_v48, %v1387_v63 }
 0x37e   :  { %2573 = vpow2.f32 %v1247_v35  ;;  %v1401_v13 = vmul.f32 %v2548_v49, %v1385_v32 }
 0x37f   :  { %1457 = vadd.xlane.f32.xlu0 %v1429_v57  ;;  %1463 = vadd.xlane.f32.xlu1 %v1432_v56  ;;  %v3186_v53 = vpop.eup %2549 }
 0x380   :  { %v2552_v41 = vpop.eup %2551 }
 0x381   :  { %v2554_v14 = vpop.eup %2553  ;;  %v1404_v44 = vmul.f32 %v2552_v41, %v1388_v43 }
 0x382   :  { %v3198_v39 = vpop.eup %2555  ;;  %v1407_v25 = vmul.f32 %v2554_v14, %v1391_v29 }
 0x383   :  { %1459 = vadd.xlane.f32.xlu1 %v1430_v10  ;;  %1461 = vadd.xlane.f32.xlu0 %v1431_v45  ;;  %v3201_v50 = vpop.eup %2557  ;;  %v1406_v2 = vmul.f32 %v3198_v39, %v1390_v0 }
 0x384   :  { %v2560_v20 = vpop.eup %2559 }
 0x385   :  { %v3207_v1 = vpop.eup %2561  ;;  %v1408_v51 = vmul.f32 %v2560_v20, %v1392_v9 }
 0x386   :  { %v3209_v60 = vpop.eup %2563  ;;  %v1411_v38 = vmul.f32 %v3207_v1, %v1395_v37 }
 0x387   :  { %v3213_v54 = vpop.eup %2565  ;;  %v1410_v46 = vmul.f32 %v3209_v60, %v1394_v58 }
 0x388   :  { %v3215_v40 = vpop.eup %2567 }
 0x389   :  { %v3219_v28 = vpop.eup %2569 }
 0x38a   :  { %v3221_v16 = vpop.eup %2571 }
 0x38b   :  { %v3225_v36 = vpop.eup %2573 }
 0x394   :  { %1521 = vperm.xlu1 %2462, %v2544_v27   ;;  %v1405_v27 = vmul.f32 %v3186_v53, %v1389_v59 }
 0x398   :  { %1526 = vperm.xlu1 %2462, %v2546_v48   ;;  %v1396_v48 = vld [vmem:[#allocation4 + $0x58] sm:$0xff] }
 0x399   :  { %1516 = vperm.xlu0 %2461, %v2548_v49   ;;  %v1412_v55 = vmul.f32 %v3215_v40, %v1396_v48 }
 0x39c   :  { %1536 = vperm.xlu1 %2462, %v3186_v53  }
 0x39d   :  { %1531 = vperm.xlu0 %2461, %v2552_v41   ;;  %v1393_v41 = vld [vmem:[#allocation4 + $0x40] sm:$0xff] }
 0x3a0   :  { %1546 = vperm.xlu1 %2462, %v2554_v14  }
 0x3a1   :  { %1541 = vperm.xlu0 %2461, %v3198_v39   ;;  %v1409_v39 = vmul.f32 %v3201_v50, %v1393_v41 }
 0x3a4   :  { %1556 = vperm.xlu1 %2462, %v3201_v50  }
 0x3a5   :  { %1551 = vperm.xlu0 %2461, %v2560_v20  }
 0x3a8   :  { %1566 = vperm.xlu1 %2462, %v3207_v1   ;;  %v1397_v1 = vld [vmem:[#allocation4 + $0x60] sm:$0xff] }
 0x3a9   :  { %1561 = vperm.xlu0 %2461, %v3209_v60  }
 0x3ac   :  { %1576 = vperm.xlu1 %2462, %v3213_v54  }
 0x3ad   :  { %1571 = vperm.xlu0 %2461, %v3215_v40   ;;  %v1400_v40 = vld [vmem:[#allocation4 + $0x78] sm:$0xff] }
 0x3ae   :  { %v1416_v50 = vmul.f32 %v3225_v36, %v1400_v40 }
 0x3b0   :  { %1586 = vperm.xlu1 %2462, %v3219_v28  }
 0x3b1   :  { %1581 = vperm.xlu0 %2461, %v3221_v16  }
 0x3b5   :  { %1591 = vperm.xlu0 %2461, %v3225_v36  }
 0x3e2   :  { %v1438_v24 = vpop.xlane.xlu0 %1437  ;;  %v1440_v22 = vpop.xlane.xlu1 %1439 }
 0x3e3   :  { %v1467_v47 = vadd.f32 %v1438_v24, %v1403_v7  ;;  %v1468_v21 = vadd.f32 %v1440_v22, %v1404_v44  ;;  %v1413_v24 = vmul.f32 %v3213_v54, %v1397_v1 }
 0x3e5   :  { %1484 = vst.msk [vmem:[#allocation4 + $0x10] sm:$0xff] %vm385_vm0, %v1467_v47  ;;  %1485 = vst.msk [vmem:[#allocation4 + $0x18] sm:$0xff] %vm385_vm0, %v1468_v21  ;;  %v1398_v47 = vld [vmem:[#allocation4 + $0x68] sm:$0xff] }
 0x3e6   :  { %v1436_v52 = vpop.xlane.xlu0 %1435  ;;  %v1434_v57 = vpop.xlane.xlu1 %1433  ;;  %v1414_v54 = vmul.f32 %v3221_v16, %v1398_v47 }
 0x3e7   :  { %v1466_v17 = vadd.f32 %v1436_v52, %v1402_v26  ;;  %v1465_v56 = vadd.f32 %v1434_v57, %v1401_v13  ;;  %v1415_v13 = vmul.f32 %v3219_v28, %v1399_v19 }
 0x3e9   :  { %1483 = vst.msk [vmem:[#allocation4 + $0x8] sm:$0xff] %vm385_vm0, %v1466_v17  ;;  %1482 = vst.msk [vmem:[#allocation4] sm:$0xff] %vm385_vm0, %v1465_v56 }
 0x3ec   :  { %v1760_v10 = vld [vmem:[#allocation4 + $0x10] sm:$0xff]  ;;  %v1761_v45 = vld [vmem:[#allocation4 + $0x18] sm:$0xff] }
 0x3ed   :  { %2575 = vrcp.f32 %v1760_v10 }
 0x3ee   :  { %2577 = vrcp.f32 %v1761_v45 }
 0x3f0   :  { %v1759_v4 = vld [vmem:[#allocation4 + $0x8] sm:$0xff]  ;;  %v1758_v31 = vld [vmem:[#allocation4] sm:$0xff] }
 0x3f1   :  { %2579 = vrcp.f32 %v1759_v4 }
 0x3f2   :  { %2581 = vrcp.f32 %v1758_v31 }
 0x3f8   :  { %v1446_v8 = vpop.xlane.xlu0 %1445  ;;  %v1448_v18 = vpop.xlane.xlu1 %1447 }
 0x3f9   :  { %v1471_v62 = vadd.f32 %v1446_v8, %v1407_v25  ;;  %v1472_v5 = vadd.f32 %v1448_v18, %v1408_v51 }
 0x3fa   :  { %v2576_v6 = vpop.eup %2575 }
 0x3fb   :  { %v2578_v23 = vpop.eup %2577  ;;  %1488 = vst.msk [vmem:[#allocation4 + $0x30] sm:$0xff] %vm385_vm0, %v1471_v62  ;;  %1489 = vst.msk [vmem:[#allocation4 + $0x38] sm:$0xff] %vm385_vm0, %v1472_v5  ;;  %1818 = vperm.xlu1 %2462, %v2576_v6  }
 0x3fc   :  { %1823 = vperm.xlu0 %2461, %v2578_v23   ;;  %v1442_v11 = vpop.xlane.xlu0 %1441  ;;  %v1444_v33 = vpop.xlane.xlu1 %1443 }
 0x3fd   :  { %v1469_v42 = vadd.f32 %v1442_v11, %v1405_v27  ;;  %v1470_v15 = vadd.f32 %v1444_v33, %v1406_v2 }
 0x3fe   :  { %v2580_v49 = vpop.eup %2579 }
 0x3ff   :  { %v2582_v30 = vpop.eup %2581  ;;  %1486 = vst.msk [vmem:[#allocation4 + $0x20] sm:$0xff] %vm385_vm0, %v1469_v42  ;;  %1487 = vst.msk [vmem:[#allocation4 + $0x28] sm:$0xff] %vm385_vm0, %v1470_v15 }
 0x400   :  { %1813 = vperm.xlu0 %2461, %v2580_v49   ;;  %1808 = vperm.xlu1 %2462, %v2582_v30   ;;  %v1454_v53 = vpop.xlane.xlu0 %1453  ;;  %v1456_v61 = vpop.xlane.xlu1 %1455 }
 0x401   :  { %v1475_v12 = vadd.f32 %v1454_v53, %v1411_v38  ;;  %v1476_v14 = vadd.f32 %v1456_v61, %v1412_v55 }
 0x402   :  { %v1764_v3 = vld [vmem:[#allocation4 + $0x30] sm:$0xff]  ;;  %v1765_v34 = vld [vmem:[#allocation4 + $0x38] sm:$0xff] }
 0x403   :  { %1492 = vst.msk [vmem:[#allocation4 + $0x50] sm:$0xff] %vm385_vm0, %v1475_v12  ;;  %1493 = vst.msk [vmem:[#allocation4 + $0x58] sm:$0xff] %vm385_vm0, %v1476_v14  ;;  %2583 = vrcp.f32 %v1764_v3 }
 0x404   :  { %v1450_v35 = vpop.xlane.xlu0 %1449  ;;  %v1452_v20 = vpop.xlane.xlu1 %1451  ;;  %2585 = vrcp.f32 %v1765_v34 }
 0x405   :  { %v1473_v63 = vadd.f32 %v1450_v35, %v1409_v39  ;;  %v1474_v43 = vadd.f32 %v1452_v20, %v1410_v46 }
 0x406   :  { %v1762_v7 = vld [vmem:[#allocation4 + $0x20] sm:$0xff]  ;;  %v1763_v44 = vld [vmem:[#allocation4 + $0x28] sm:$0xff] }
 0x407   :  { %1490 = vst.msk [vmem:[#allocation4 + $0x40] sm:$0xff] %vm385_vm0, %v1473_v63  ;;  %1491 = vst.msk [vmem:[#allocation4 + $0x48] sm:$0xff] %vm385_vm0, %v1474_v43  ;;  %2587 = vrcp.f32 %v1762_v7 }
 0x408   :  { %v1458_v60 = vpop.xlane.xlu0 %1457  ;;  %v1464_v22 = vpop.xlane.xlu1 %1463  ;;  %2589 = vrcp.f32 %v1763_v44 }
 0x409   :  { %v1477_v21 = vadd.f32 %v1458_v60, %v1413_v24  ;;  %v1480_v32 = vadd.f32 %v1464_v22, %v1416_v50 }
 0x40a   :  { %v1768_v26 = vld [vmem:[#allocation4 + $0x50] sm:$0xff]  ;;  %v1769_v52 = vld [vmem:[#allocation4 + $0x58] sm:$0xff] }
 0x40b   :  { %1494 = vst.msk [vmem:[#allocation4 + $0x60] sm:$0xff] %vm385_vm0, %v1477_v21  ;;  %1497 = vst.msk [vmem:[#allocation4 + $0x78] sm:$0xff] %vm385_vm0, %v1480_v32  ;;  %2591 = vrcp.f32 %v1768_v26 }
 0x40c   :  { %v1462_v36 = vpop.xlane.xlu0 %1461  ;;  %v1460_v17 = vpop.xlane.xlu1 %1459  ;;  %2593 = vrcp.f32 %v1769_v52 }
 0x40d   :  { %v1479_v57 = vadd.f32 %v1462_v36, %v1415_v13  ;;  %v1478_v56 = vadd.f32 %v1460_v17, %v1414_v54 }
 0x40e   :  { %v1766_v10 = vld [vmem:[#allocation4 + $0x40] sm:$0xff]  ;;  %v1767_v45 = vld [vmem:[#allocation4 + $0x48] sm:$0xff] }
 0x40f   :  { %1496 = vst.msk [vmem:[#allocation4 + $0x70] sm:$0xff] %vm385_vm0, %v1479_v57  ;;  %1495 = vst.msk [vmem:[#allocation4 + $0x68] sm:$0xff] %vm385_vm0, %v1478_v56  ;;  %2595 = vrcp.f32 %v1766_v10 }
 0x410   :  { %v2584_v4 = vpop.eup %2583  ;;  %2597 = vrcp.f32 %v1767_v45  ;;  %v1522_v27 = vpop.permute.xlu1 %1521 }
 0x411   :  { %v2586_v31 = vpop.eup %2585  ;;  %1838 = vperm.xlu1 %2462, %v2584_v4   ;;  %v1595_v44 = vmul.f32 0.0, %v1522_v27 }
 0x412   :  { %1843 = vperm.xlu0 %2461, %v2586_v31   ;;  %v1770_v28 = vld [vmem:[#allocation4 + $0x60] sm:$0xff]  ;;  %v1773_v18 = vld [vmem:[#allocation4 + $0x78] sm:$0xff] }
 0x413   :  { %2599 = vrcp.f32 %v1770_v28 }
 0x414   :  { %v2588_v16 = vpop.eup %2587  ;;  %v1517_v2 = vpop.permute.xlu0 %1516 }
 0x415   :  { %v2590_v29 = vpop.eup %2589  ;;  %1828 = vperm.xlu1 %2462, %v2588_v16   ;;  %v1527_v11 = vpop.permute.xlu1 %1526  ;;  %v1594_v24 = vmul.f32 0.0, %v1517_v2 }
 0x416   :  { %1833 = vperm.xlu0 %2461, %v2590_v29   ;;  %v1772_v9 = vld [vmem:[#allocation4 + $0x70] sm:$0xff]  ;;  %v1771_v25 = vld [vmem:[#allocation4 + $0x68] sm:$0xff]  ;;  %v1596_v39 = vmul.f32 0.0, %v1527_v11 }
 0x417   :  { %2601 = vrcp.f32 %v1772_v9 }
 0x418   :  { %v2592_v51 = vpop.eup %2591  ;;  %2603 = vrcp.f32 %v1771_v25  ;;  %v1532_v33 = vpop.permute.xlu0 %1531 }
 0x419   :  { %v2594_v8 = vpop.eup %2593  ;;  %1858 = vperm.xlu1 %2462, %v2592_v51   ;;  %2605 = vrcp.f32 %v1773_v18  ;;  %v1537_v37 = vpop.permute.xlu1 %1536  ;;  %v1597_v35 = vmul.f32 0.0, %v1532_v33 }
 0x41a   :  { %1863 = vperm.xlu0 %2461, %v2594_v8   ;;  %v1598_v28 = vmul.f32 0.0, %v1537_v37 }
 0x41c   :  { %v2596_v59 = vpop.eup %2595  ;;  %v1542_v48 = vpop.permute.xlu0 %1541 }
 0x41d   :  { %v2598_v0 = vpop.eup %2597  ;;  %1848 = vperm.xlu1 %2462, %v2596_v59   ;;  %v1547_v42 = vpop.permute.xlu1 %1546  ;;  %v1599_v25 = vmul.f32 0.0, %v1542_v48 }
 0x41e   :  { %1853 = vperm.xlu0 %2461, %v2598_v0   ;;  %v2433_v38 = vpop.f32.mrf.mxu0  ;;  %v1600_v57 = vmul.f32 0.0, %v1547_v42 }
 0x41f   :  { %v1709_v20 = vadd.f32 %v2433_v38, %v1596_v39 }
 0x420   :  { %v2600_v62 = vpop.eup %2599  ;;  %v1552_v15 = vpop.permute.xlu0 %1551 }
 0x421   :  { %1868 = vperm.xlu1 %2462, %v2600_v62   ;;  %v3254_v49 = vpop.permute.xlu1 %1556  ;;  %v1644_v53 = vpop.f32.mrf.mxu0  ;;  %v1601_v10 = vmul.f32 0.0, %v1552_v15 }
 0x422   :  { %v1707_v22 = vadd.f32 %v1644_v53, %v1594_v24  ;;  %v1602_v15 = vmul.f32 0.0, %v3254_v49 }
 0x423   :  { %v2434_v41 = vpop.f32.mrf.mxu0 }
 0x424   :  { %v2602_v5 = vpop.eup %2601  ;;  %v3256_v30 = vpop.permute.xlu0 %1561  ;;  %v1710_v40 = vadd.f32 %v2434_v41, %v1597_v35 }
 0x425   :  { %v2604_v6 = vpop.eup %2603  ;;  %1878 = vperm.xlu1 %2462, %v2602_v5   ;;  %v1567_v55 = vpop.permute.xlu1 %1566  ;;  %v1603_v41 = vmul.f32 0.0, %v3256_v30 }
 0x426   :  { %1873 = vperm.xlu0 %2461, %v2604_v6   ;;  %v2606_v23 = vpop.eup %2605  ;;  %v1647_v14 = vpop.f32.mrf.mxu0  ;;  %v1604_v62 = vmul.f32 0.0, %v1567_v55 }
 0x427   :  { %v1708_v19 = vadd.f32 %v1647_v14, %v1595_v44 }
 0x428   :  { %v1572_v61 = vpop.permute.xlu0 %1571 }
 0x429   :  { %v3258_v58 = vpop.permute.xlu1 %1576  ;;  %v1605_v27 = vmul.f32 0.0, %v1572_v61 }
 0x42a   :  { %1883 = vperm.xlu0 %2461, %v2606_v23   ;;  %v1606_v49 = vmul.f32 0.0, %v3258_v58 }
 0x42c   :  { %v3260_v12 = vpop.permute.xlu0 %1581 }
 0x42d   :  { %v2437_v3 = vpop.f32.mrf.mxu0  ;;  %v3262_v34 = vpop.permute.xlu1 %1586  ;;  %v1607_v44 = vmul.f32 0.0, %v3260_v12 }
 0x42e   :  { %v1713_v45 = vadd.f32 %v2437_v3, %v1600_v57 }
 0x42f   :  { %v1660_v1 = vpop.f32.mrf.mxu0 }
 0x430   :  { %v3264_v46 = vpop.permute.xlu0 %1591  ;;  %v1711_v8 = vadd.f32 %v1660_v1, %v1598_v28 }
 0x431   :  { %v2438_v60 = vpop.f32.mrf.mxu0 }
 0x432   :  { %v1714_v4 = vadd.f32 %v2438_v60, %v1601_v10  ;;  %v1608_v60 = vmul.f32 0.0, %v3262_v34 }
 0x433   :  { %v1663_v13 = vpop.f32.mrf.mxu0 }
 0x434   :  { %v1712_v18 = vadd.f32 %v1663_v13, %v1599_v25 }
 0x435   :  { %v2441_v36 = vpop.f32.mrf.mxu0 }
 0x436   :  { %v1717_v11 = vadd.f32 %v2441_v36, %v1604_v62 }
 0x437   :  { %v1676_v17 = vpop.f32.mrf.mxu0 }
 0x438   :  { %v1715_v55 = vadd.f32 %v1676_v17, %v1602_v15 }
 0x439   :  { %v2442_v56 = vpop.f32.mrf.mxu0 }
 0x43a   :  { %v1718_v33 = vadd.f32 %v2442_v56, %v1605_v27 }
 0x43b   :  { %v1679_v16 = vpop.f32.mrf.mxu0 }
 0x43c   :  { %v1716_v3 = vadd.f32 %v1679_v16, %v1603_v41 }
 0x43d   :  { %v2445_v5 = vpop.f32.mrf.mxu0 }
 0x43f   :  { %v1692_v38 = vpop.f32.mrf.mxu0 }
 0x440   :  { %v1719_v30 = vadd.f32 %v1692_v38, %v1606_v49 }
 0x441   :  { %v2446_v61 = vpop.f32.mrf.mxu0 }
 0x476   :  { %v1819_v63 = vpop.permute.xlu1 %1818 }
 0x477   :  { %v1824_v43 = vpop.permute.xlu0 %1823  ;;  %v1888_v7 = vmul.f32 %v1819_v63, %v1709_v20 }
 0x478   :  { %v1889_v50 = vmul.f32 %v1824_v43, %v1710_v40  ;;  %v1695_v43 = vpop.f32.mrf.mxu0 }
 0x479   :  { %v1720_v24 = vadd.f32 %v1695_v43, %v1607_v44 }
 0x47a   :  { %v2161_v47 = vpack.c.bf16 %v1889_v50, %v1888_v7 }
 0x47b   :  { %v1814_v21 = vpop.permute.xlu0 %1813  ;;  %v1809_v32 = vpop.permute.xlu1 %1808 }
 0x47c   :  { %2200 = vst [vmem:[#allocation14 + $0x8] sm:$0xff] %v2161_v47   ;;  %v1887_v26 = vmul.f32 %v1814_v21, %v1708_v19  ;;  %v1886_v52 = vmul.f32 %v1809_v32, %v1707_v22  ;;  %v1609_v22 = vmul.f32 0.0, %v3264_v46  ;;  %v1721_v32 = vadd.f32 %v2445_v5, %v1608_v60 }
 0x47e   :  { %v2156_v54 = vpack.c.bf16 %v1887_v26, %v1886_v52  ;;  %v1722_v26 = vadd.f32 %v2446_v61, %v1609_v22 }
 0x480   :  { %2157 = vst [vmem:[#allocation14] sm:$0xff] %v2156_v54  }
 0x48c   :  { %v1839_v31 = vpop.permute.xlu1 %1838 }
 0x48d   :  { %v1844_v29 = vpop.permute.xlu0 %1843  ;;  %v1892_v9 = vmul.f32 %v1839_v31, %v1713_v45 }
 0x48e   :  { %v1893_v51 = vmul.f32 %v1844_v29, %v1714_v4 }
 0x490   :  { %v2171_v59 = vpack.c.bf16 %v1893_v51, %v1892_v9  ;;  %v1829_v0 = vpop.permute.xlu1 %1828 }
 0x491   :  { %v1834_v6 = vpop.permute.xlu0 %1833  ;;  %v1890_v23 = vmul.f32 %v1829_v0, %v1711_v8 }
 0x492   :  { %2202 = vst [vmem:[#allocation14 + $0x18] sm:$0xff] %v2171_v59   ;;  %v1891_v2 = vmul.f32 %v1834_v6, %v1712_v18 }
 0x494   :  { %v2166_v42 = vpack.c.bf16 %v1891_v2, %v1890_v23  ;;  %v1859_v37 = vpop.permute.xlu1 %1858 }
 0x495   :  { %v1864_v48 = vpop.permute.xlu0 %1863  ;;  %v1896_v53 = vmul.f32 %v1859_v37, %v1717_v11 }
 0x496   :  { %2201 = vst [vmem:[#allocation14 + $0x10] sm:$0xff] %v2166_v42   ;;  %v1897_v14 = vmul.f32 %v1864_v48, %v1718_v33 }
 0x498   :  { %v2181_v39 = vpack.c.bf16 %v1897_v14, %v1896_v53  ;;  %v1849_v35 = vpop.permute.xlu1 %1848 }
 0x499   :  { %v1854_v20 = vpop.permute.xlu0 %1853  ;;  %v1894_v1 = vmul.f32 %v1849_v35, %v1715_v55 }
 0x49a   :  { %2204 = vst [vmem:[#allocation14 + $0x28] sm:$0xff] %v2181_v39   ;;  %v1895_v40 = vmul.f32 %v1854_v20, %v1716_v3 }
 0x49c   :  { %v2176_v63 = vpack.c.bf16 %v1895_v40, %v1894_v1  ;;  %v1869_v7 = vpop.permute.xlu1 %1868 }
 0x49d   :  { %v1898_v19 = vmul.f32 %v1869_v7, %v1719_v30 }
 0x49e   :  { %2203 = vst [vmem:[#allocation14 + $0x20] sm:$0xff] %v2176_v63  }
 0x4a0   :  { %v1879_v21 = vpop.permute.xlu1 %1878 }
 0x4a1   :  { %v1874_v50 = vpop.permute.xlu0 %1873  ;;  %v1900_v58 = vmul.f32 %v1879_v21, %v1721_v32 }
 0x4a2   :  { %v1899_v47 = vmul.f32 %v1874_v50, %v1720_v24 }
 0x4a4   :  { %v2186_v52 = vpack.c.bf16 %v1899_v47, %v1898_v19 }
 0x4a5   :  { %v1884_v13 = vpop.permute.xlu0 %1883 }
 0x4a6   :  { %2205 = vst [vmem:[#allocation14 + $0x30] sm:$0xff] %v2186_v52   ;;  %v1901_v12 = vmul.f32 %v1884_v13, %v1722_v26 }
 0x4a8   :  { %v2191_v54 = vpack.c.bf16 %v1901_v12, %v1900_v58 }
 0x4aa   :  { %2206 = vst [vmem:[#allocation14 + $0x38] sm:$0xff] %v2191_v54  }
 0x4ab   :  { %2698 = shalt.err (!%p2695_p10)
}
 0x4ac   :  { %1993 = dma.vmem_to_hbm [thread:$0]  %s1988_s3, 1024, %s3282_s4, [#allocation8], %s2717_s20, %s2717_s20, %s2718_s21  }
 0x4ad   :  { %2713 = dma.done.wait [#allocation8], 1024  }
 0x4ae   :  { %2714 = vsyncadd [#allocation8], 4294966272 }
 0x4af   :  { %1997 = vsyncpa [#allocation7], 1 }
 0x4b0   :  { %1998 = vsyncpa [#allocation10], 1 }
 0x4b1   :  { %1999 = vsyncpa [#allocation13], 1 }
 0x4b2   :  { %2000 = vsyncpa [#allocation8], 1 }

</bundles_post_ra>
